<compile_context>
chip_gen: v7x
topology: tpu7x:2x2x1
jax: 0.10.0
libtpu: 0.0.40
codegen_flags: <defaults>
</compile_context>

<pallas_src>
import functools

import jax
import jax.numpy as jnp
import numpy as np
from jax import lax
from jax.experimental import pallas as pl
from jax.experimental.pallas import tpu as pltpu


def _round_up(x, m):
    return (x + m - 1) // m * m


def _coarse_matching_kernel(ref_ref, src_ref,            # inputs  (VMEM)
                            ref_idx_ref, src_idx_ref,    # outputs (SMEM)
                            score_ref,                   # output  (SMEM)
                            s_ref,                       # scratch (VMEM [M_pad, N_pad] f32)
                            *, M, N, K):
    M_pad = ref_ref.shape[0]
    N_pad = src_ref.shape[0]
    neg_inf = jnp.float32(-jnp.inf)

    # ---- scores on the MXU (f32 accumulation); exp deferred to the K winners ----
    # xy[m, n] = <ref[m], src[n]>   (contract the channel dim of both operands)
    xy = lax.dot_general(ref_ref[...], src_ref[...],
                         dimension_numbers=(((1,), (1,)), ((), ())),
                         preferred_element_type=jnp.float32)       # [M_pad, N_pad]

    col_iota = lax.broadcasted_iota(jnp.int32, (M_pad, N_pad), 1)
    if N_pad != N:                                                 # mask padded columns
        xy = jnp.where(col_iota >= N, neg_inf, xy)
    s_ref[...] = xy

    # ---- initial per-row max / argmax (single full-tile pass, kept in vregs) ----
    row_iota = lax.broadcasted_iota(jnp.int32, (M_pad, 1), 0)      # [M_pad, 1]
    rmax = jnp.max(xy, axis=-1, keepdims=True)                     # [M_pad, 1] f32
    rarg = jnp.min(jnp.where(xy == rmax, col_iota, jnp.int32(N_pad)),
                   axis=-1, keepdims=True)                         # [M_pad, 1] i32
    if M_pad != M:                                                 # mask padded rows
        rmax = jnp.where(row_iota >= M, neg_inf, rmax)

    col_iota_row = lax.broadcasted_iota(jnp.int32, (1, N_pad), 1)  # [1, N_pad]

    # ---- K pops, each O(M + N); fully unrolled ----
    def body(i, carry):
        rmax, rarg = carry
        gmax = jnp.max(rmax)                                              # scalar f32
        r = jnp.min(jnp.where(rmax == gmax, row_iota, jnp.int32(M_pad)))  # scalar i32
        c = jnp.min(jnp.where(row_iota == r, rarg, jnp.int32(N_pad)))     # = rarg[r]

        score_ref[i] = jnp.exp(2.0 * gmax - 2.0)   # exp only on the winner
        ref_idx_ref[i] = r
        src_idx_ref[i] = c

        # mask the popped element and refresh only row r's max / argmax
        row = s_ref[pl.ds(r, 1), :]                                 # [1, N_pad]
        row = jnp.where(col_iota_row == c, neg_inf, row)
        s_ref[pl.ds(r, 1), :] = row
        new_max = jnp.max(row)
        new_arg = jnp.min(jnp.where(row == new_max, col_iota_row,
                                    jnp.int32(N_pad)))
        sel = row_iota == r
        rmax = jnp.where(sel, new_max, rmax)
        rarg = jnp.where(sel, new_arg, rarg)
        return rmax, rarg

    lax.fori_loop(0, K, body, (rmax, rarg), unroll=True)


def coarse_matching(ref_feats, src_feats, num_proposal, *, use_bf16_mxu=False):
    """ref_feats: [M, C] f32 (L2-normalized), src_feats: [N, C] f32.
    Returns (ref_corr_indices [K] i32, src_corr_indices [K] i32, corr_scores [K] f32)."""
    M, C = ref_feats.shape
    N, C2 = src_feats.shape
    assert C == C2
    K = int(num_proposal)

    # lane-dense score tile: N on the 128-lane axis, M on sublanes.
    M_pad = _round_up(M, 8)
    N_pad = _round_up(N, 128)
    ref_p = jnp.pad(ref_feats, ((0, M_pad - M), (0, 0)))
    src_p = jnp.pad(src_feats, ((0, N_pad - N), (0, 0)))
    if use_bf16_mxu:
        # v6e/v7x: bf16 MXU operands with f32 accumulation; selection/compare
        # stays in f32 (the dtype the maxes are taken in).
        ref_p = ref_p.astype(jnp.bfloat16)
        src_p = src_p.astype(jnp.bfloat16)

    kernel = functools.partial(_coarse_matching_kernel, M=M, N=N, K=K)

    cost = pl.CostEstimate(
        flops=2 * M_pad * N_pad * C,
        transcendentals=K,
        bytes_accessed=(M_pad * C + N_pad * C) * ref_p.dtype.itemsize
        + M_pad * N_pad * 4 + 3 * K * 4,
    )

    # TODO(synk): for very large M, N, tile over M with a ("parallel",) grid
    # (uses both v7x TensorCores, bounds VMEM to a [tm, N_pad] slab) and merge
    # per-block top-K candidate lists in a tiny epilogue.
    return pl.pallas_call(
        kernel,
        out_shape=(
            jax.ShapeDtypeStruct((K,), jnp.int32),    # ref_corr_indices
            jax.ShapeDtypeStruct((K,), jnp.int32),    # src_corr_indices
            jax.ShapeDtypeStruct((K,), jnp.float32),  # corr_scores
        ),
        in_specs=[
            pl.BlockSpec(memory_space=pltpu.MemorySpace.VMEM),
            pl.BlockSpec(memory_space=pltpu.MemorySpace.VMEM),
        ],
        out_specs=(
            pl.BlockSpec(memory_space=pltpu.MemorySpace.SMEM),
            pl.BlockSpec(memory_space=pltpu.MemorySpace.SMEM),
            pl.BlockSpec(memory_space=pltpu.MemorySpace.SMEM),
        ),
        scratch_shapes=[pltpu.VMEM((M_pad, N_pad), jnp.float32)],
        compiler_params=pltpu.CompilerParams(vmem_limit_bytes=32 * 1024 * 1024),
        cost_estimate=cost,
    )(ref_p, src_p)


if __name__ == "__main__":
    key = jax.random.PRNGKey(0)
    M, N, C = 16, 16, 32
    NUM_PROPOSAL = 8

    k1, k2 = jax.random.split(key)
    ref_feats = jax.random.normal(k1, (M, C), dtype=jnp.float32)
    src_feats = jax.random.normal(k2, (N, C), dtype=jnp.float32)
    # pairwise_distance(..., normalized=True) assumes L2-normalized features
    ref_feats = ref_feats / jnp.linalg.norm(ref_feats, axis=-1, keepdims=True)
    src_feats = src_feats / jnp.linalg.norm(src_feats, axis=-1, keepdims=True)

    ref_idx, src_idx, corr_scores = coarse_matching(ref_feats, src_feats, NUM_PROPOSAL)
    jax.block_until_ready((ref_idx, src_idx, corr_scores))

    # lightweight reference check (plain JAX)
    scores_full = jnp.exp(2.0 * (ref_feats @ src_feats.T) - 2.0)
    ref_vals, _ = jax.lax.top_k(scores_full.reshape(-1), NUM_PROPOSAL)
    np.testing.assert_allclose(np.asarray(corr_scores), np.asarray(ref_vals),
                               rtol=1e-5, atol=1e-6)
    # the (ref_idx, src_idx) pairs must point back to those scores
    gathered = scores_full[np.asarray(ref_idx), np.asarray(src_idx)]
    np.testing.assert_allclose(np.asarray(corr_scores), np.asarray(gathered),
                               rtol=1e-5, atol=1e-6)
    assert int(ref_idx.max()) < M and int(src_idx.max()) < N

    print("KERNEL_OK")
</pallas_src>

<mosaic_0001>
module attributes {stable_mosaic.version = 11 : i64} {
  func.func @_coarse_matching_kernel(%arg0: memref<16x32xf32, #tpu.memory_space<vmem>>, %arg1: memref<128x32xf32, #tpu.memory_space<vmem>>, %arg2: memref<8xi32, #tpu.memory_space<smem>>, %arg3: memref<8xi32, #tpu.memory_space<smem>>, %arg4: memref<8xf32, #tpu.memory_space<smem>>, %arg5: memref<16x128xf32, #tpu.memory_space<vmem>>) attributes {dimension_semantics = [], scalar_prefetch = 0 : i64, scratch_operands = 1 : i64, tpu.core_type = #tpu.core_type<tc>} {
    %c0 = arith.constant 0 : index
    %c0_0 = arith.constant 0 : index
    %0 = vector.load %arg0[%c0, %c0_0] : memref<16x32xf32, #tpu.memory_space<vmem>>, vector<16x32xf32>
    %c0_1 = arith.constant 0 : index
    %c0_2 = arith.constant 0 : index
    %1 = vector.load %arg1[%c0_1, %c0_2] : memref<128x32xf32, #tpu.memory_space<vmem>>, vector<128x32xf32>
    %cst = arith.constant dense<0.000000e+00> : vector<16x128xf32>
    %2 = tpu.matmul %0, %1, %cst {dimension_numbers = #tpu.dot_dimension_numbers<[1], [1], [0], [0], [0, 0, 1, 0], [], []>} : vector<16x32xf32>, vector<128x32xf32>, vector<16x128xf32> -> vector<16x128xf32>
    %3 = tpu.iota {dimensions = array<i32: 1>} : vector<16x128xi32>
    %c16_i32 = arith.constant 16 : i32
    %4 = vector.broadcast %c16_i32 : i32 to vector<16x128xi32>
    %5 = arith.cmpi sge, %3, %4 : vector<16x128xi32>
    %cst_3 = arith.constant 0xFF800000 : f32
    %6 = vector.broadcast %cst_3 : f32 to vector<16x128xf32>
    %7 = arith.select %5, %6, %2 : vector<16x128xi1>, vector<16x128xf32>
    %c0_4 = arith.constant 0 : index
    %c0_5 = arith.constant 0 : index
    %8 = vector.load %arg5[%c0_4, %c0_5] : memref<16x128xf32, #tpu.memory_space<vmem>>, vector<16x128xf32>
    tpu.vector_store %arg5[%c0_4, %c0_5], %7 {strides = array<i32>} : memref<16x128xf32, #tpu.memory_space<vmem>>, vector<16x128xf32>,
    %9 = tpu.iota {dimensions = array<i32: 0>} : vector<16x1xi32>
    %cst_6 = arith.constant dense<0xFF800000> : vector<16xf32>
    %10 = vector.multi_reduction <maximumf>, %7, %cst_6 [1] : vector<16x128xf32> to vector<16xf32>
    %11 = vector.shape_cast %10 : vector<16xf32> to vector<16x1xf32>
    %12 = vector.broadcast %11 : vector<16x1xf32> to vector<16x128xf32>
    %13 = arith.cmpf oeq, %7, %12 : vector<16x128xf32>
    %c128_i32 = arith.constant 128 : i32
    %14 = vector.broadcast %c128_i32 : i32 to vector<16x128xi32>
    %15 = arith.select %13, %3, %14 : vector<16x128xi1>, vector<16x128xi32>
    %cst_7 = arith.constant dense<2147483647> : vector<16xi32>
    %16 = vector.multi_reduction <minsi>, %15, %cst_7 [1] : vector<16x128xi32> to vector<16xi32>
    %17 = vector.shape_cast %16 : vector<16xi32> to vector<16x1xi32>
    %18 = tpu.iota {dimensions = array<i32: 1>} : vector<1x128xi32>
    %cst_8 = arith.constant 0xFF800000 : f32
    %c0_i32 = arith.constant 0 : i32
    %19 = vector.shape_cast %11 : vector<16x1xf32> to vector<1x16x1xf32>
    %cst_9 = arith.constant dense<0xFF800000> : vector<1xf32>
    %20 = vector.multi_reduction <maximumf>, %19, %cst_9 [1, 2] : vector<1x16x1xf32> to vector<1xf32>
    %21 = vector.shape_cast %20 : vector<1xf32> to vector<1x1x1xf32>
    %22 = vector.extract %21[0, 0, 0] : f32 from vector<1x1x1xf32>
    %23 = vector.broadcast %22 : f32 to vector<16x1xf32>
    %24 = arith.cmpf oeq, %11, %23 : vector<16x1xf32>
    %c16_i32_10 = arith.constant 16 : i32
    %25 = vector.broadcast %c16_i32_10 : i32 to vector<16x1xi32>
    %26 = arith.select %24, %9, %25 : vector<16x1xi1>, vector<16x1xi32>
    %27 = vector.shape_cast %26 : vector<16x1xi32> to vector<1x16x1xi32>
    %cst_11 = arith.constant dense<2147483647> : vector<1xi32>
    %28 = vector.multi_reduction <minsi>, %27, %cst_11 [1, 2] : vector<1x16x1xi32> to vector<1xi32>
    %29 = vector.shape_cast %28 : vector<1xi32> to vector<1x1x1xi32>
    %30 = vector.extract %29[0, 0, 0] : i32 from vector<1x1x1xi32>
    %31 = vector.broadcast %30 : i32 to vector<16x1xi32>
    %32 = arith.cmpi eq, %9, %31 : vector<16x1xi32>
    %c128_i32_12 = arith.constant 128 : i32
    %33 = vector.broadcast %c128_i32_12 : i32 to vector<16x1xi32>
    %34 = arith.select %32, %17, %33 : vector<16x1xi1>, vector<16x1xi32>
    %35 = vector.shape_cast %34 : vector<16x1xi32> to vector<1x16x1xi32>
    %cst_13 = arith.constant dense<2147483647> : vector<1xi32>
    %36 = vector.multi_reduction <minsi>, %35, %cst_13 [1, 2] : vector<1x16x1xi32> to vector<1xi32>
    %37 = vector.shape_cast %36 : vector<1xi32> to vector<1x1x1xi32>
    %38 = vector.extract %37[0, 0, 0] : i32 from vector<1x1x1xi32>
    %cst_14 = arith.constant 2.000000e+00 : f32
    %39 = arith.mulf %cst_14, %22 : f32
    %cst_15 = arith.constant 2.000000e+00 : f32
    %40 = arith.subf %39, %cst_15 : f32
    %41 = math.exp %40 : f32
    %42 = arith.index_cast %c0_i32 : i32 to index
    %43 = memref.load %arg4[%42] : memref<8xf32, #tpu.memory_space<smem>>
    memref.store %41, %arg4[%42] : memref<8xf32, #tpu.memory_space<smem>>
    %44 = arith.index_cast %c0_i32 : i32 to index
    %45 = memref.load %arg2[%44] : memref<8xi32, #tpu.memory_space<smem>>
    memref.store %30, %arg2[%44] : memref<8xi32, #tpu.memory_space<smem>>
    %46 = arith.index_cast %c0_i32 : i32 to index
    %47 = memref.load %arg3[%46] : memref<8xi32, #tpu.memory_space<smem>>
    memref.store %38, %arg3[%46] : memref<8xi32, #tpu.memory_space<smem>>
    %48 = arith.index_cast %30 : i32 to index
    %c0_16 = arith.constant 0 : index
    %49 = vector.load %arg5[%48, %c0_16] : memref<16x128xf32, #tpu.memory_space<vmem>>, vector<1x128xf32>
    %50 = vector.broadcast %38 : i32 to vector<1x128xi32>
    %51 = arith.cmpi eq, %18, %50 : vector<1x128xi32>
    %52 = vector.broadcast %cst_8 : f32 to vector<1x128xf32>
    %53 = arith.select %51, %52, %49 : vector<1x128xi1>, vector<1x128xf32>
    %54 = arith.index_cast %30 : i32 to index
    %c0_17 = arith.constant 0 : index
    %55 = vector.load %arg5[%54, %c0_17] : memref<16x128xf32, #tpu.memory_space<vmem>>, vector<1x128xf32>
    tpu.vector_store %arg5[%54, %c0_17], %53 {strides = array<i32>} : memref<16x128xf32, #tpu.memory_space<vmem>>, vector<1x128xf32>,
    %56 = vector.shape_cast %53 : vector<1x128xf32> to vector<1x1x128xf32>
    %cst_18 = arith.constant dense<0xFF800000> : vector<1xf32>
    %57 = vector.multi_reduction <maximumf>, %56, %cst_18 [1, 2] : vector<1x1x128xf32> to vector<1xf32>
    %58 = vector.shape_cast %57 : vector<1xf32> to vector<1x1x1xf32>
    %59 = vector.extract %58[0, 0, 0] : f32 from vector<1x1x1xf32>
    %60 = vector.broadcast %59 : f32 to vector<1x128xf32>
    %61 = arith.cmpf oeq, %53, %60 : vector<1x128xf32>
    %c128_i32_19 = arith.constant 128 : i32
    %62 = vector.broadcast %c128_i32_19 : i32 to vector<1x128xi32>
    %63 = arith.select %61, %18, %62 : vector<1x128xi1>, vector<1x128xi32>
    %64 = vector.shape_cast %63 : vector<1x128xi32> to vector<1x1x128xi32>
    %cst_20 = arith.constant dense<2147483647> : vector<1xi32>
    %65 = vector.multi_reduction <minsi>, %64, %cst_20 [1, 2] : vector<1x1x128xi32> to vector<1xi32>
    %66 = vector.shape_cast %65 : vector<1xi32> to vector<1x1x1xi32>
    %67 = vector.extract %66[0, 0, 0] : i32 from vector<1x1x1xi32>
    %68 = vector.broadcast %30 : i32 to vector<16x1xi32>
    %69 = arith.cmpi eq, %9, %68 : vector<16x1xi32>
    %70 = vector.broadcast %59 : f32 to vector<16x1xf32>
    %71 = arith.select %69, %70, %11 : vector<16x1xi1>, vector<16x1xf32>
    %72 = vector.broadcast %67 : i32 to vector<16x1xi32>
    %73 = arith.select %69, %72, %17 : vector<16x1xi1>, vector<16x1xi32>
    %c1_i32 = arith.constant 1 : i32
    %74 = vector.shape_cast %71 : vector<16x1xf32> to vector<1x16x1xf32>
    %cst_21 = arith.constant dense<0xFF800000> : vector<1xf32>
    %75 = vector.multi_reduction <maximumf>, %74, %cst_21 [1, 2] : vector<1x16x1xf32> to vector<1xf32>
    %76 = vector.shape_cast %75 : vector<1xf32> to vector<1x1x1xf32>
    %77 = vector.extract %76[0, 0, 0] : f32 from vector<1x1x1xf32>
    %78 = vector.broadcast %77 : f32 to vector<16x1xf32>
    %79 = arith.cmpf oeq, %71, %78 : vector<16x1xf32>
    %c16_i32_22 = arith.constant 16 : i32
    %80 = vector.broadcast %c16_i32_22 : i32 to vector<16x1xi32>
    %81 = arith.select %79, %9, %80 : vector<16x1xi1>, vector<16x1xi32>
    %82 = vector.shape_cast %81 : vector<16x1xi32> to vector<1x16x1xi32>
    %cst_23 = arith.constant dense<2147483647> : vector<1xi32>
    %83 = vector.multi_reduction <minsi>, %82, %cst_23 [1, 2] : vector<1x16x1xi32> to vector<1xi32>
    %84 = vector.shape_cast %83 : vector<1xi32> to vector<1x1x1xi32>
    %85 = vector.extract %84[0, 0, 0] : i32 from vector<1x1x1xi32>
    %86 = vector.broadcast %85 : i32 to vector<16x1xi32>
    %87 = arith.cmpi eq, %9, %86 : vector<16x1xi32>
    %c128_i32_24 = arith.constant 128 : i32
    %88 = vector.broadcast %c128_i32_24 : i32 to vector<16x1xi32>
    %89 = arith.select %87, %73, %88 : vector<16x1xi1>, vector<16x1xi32>
    %90 = vector.shape_cast %89 : vector<16x1xi32> to vector<1x16x1xi32>
    %cst_25 = arith.constant dense<2147483647> : vector<1xi32>
    %91 = vector.multi_reduction <minsi>, %90, %cst_25 [1, 2] : vector<1x16x1xi32> to vector<1xi32>
    %92 = vector.shape_cast %91 : vector<1xi32> to vector<1x1x1xi32>
    %93 = vector.extract %92[0, 0, 0] : i32 from vector<1x1x1xi32>
    %cst_26 = arith.constant 2.000000e+00 : f32
    %94 = arith.mulf %cst_26, %77 : f32
    %cst_27 = arith.constant 2.000000e+00 : f32
    %95 = arith.subf %94, %cst_27 : f32
    %96 = math.exp %95 : f32
    %97 = arith.index_cast %c1_i32 : i32 to index
    %98 = memref.load %arg4[%97] : memref<8xf32, #tpu.memory_space<smem>>
    memref.store %96, %arg4[%97] : memref<8xf32, #tpu.memory_space<smem>>
    %99 = arith.index_cast %c1_i32 : i32 to index
    %100 = memref.load %arg2[%99] : memref<8xi32, #tpu.memory_space<smem>>
    memref.store %85, %arg2[%99] : memref<8xi32, #tpu.memory_space<smem>>
    %101 = arith.index_cast %c1_i32 : i32 to index
    %102 = memref.load %arg3[%101] : memref<8xi32, #tpu.memory_space<smem>>
    memref.store %93, %arg3[%101] : memref<8xi32, #tpu.memory_space<smem>>
    %103 = arith.index_cast %85 : i32 to index
    %c0_28 = arith.constant 0 : index
    %104 = vector.load %arg5[%103, %c0_28] : memref<16x128xf32, #tpu.memory_space<vmem>>, vector<1x128xf32>
    %105 = vector.broadcast %93 : i32 to vector<1x128xi32>
    %106 = arith.cmpi eq, %18, %105 : vector<1x128xi32>
    %107 = vector.broadcast %cst_8 : f32 to vector<1x128xf32>
    %108 = arith.select %106, %107, %104 : vector<1x128xi1>, vector<1x128xf32>
    %109 = arith.index_cast %85 : i32 to index
    %c0_29 = arith.constant 0 : index
    %110 = vector.load %arg5[%109, %c0_29] : memref<16x128xf32, #tpu.memory_space<vmem>>, vector<1x128xf32>
    tpu.vector_store %arg5[%109, %c0_29], %108 {strides = array<i32>} : memref<16x128xf32, #tpu.memory_space<vmem>>, vector<1x128xf32>,
    %111 = vector.shape_cast %108 : vector<1x128xf32> to vector<1x1x128xf32>
    %cst_30 = arith.constant dense<0xFF800000> : vector<1xf32>
    %112 = vector.multi_reduction <maximumf>, %111, %cst_30 [1, 2] : vector<1x1x128xf32> to vector<1xf32>
    %113 = vector.shape_cast %112 : vector<1xf32> to vector<1x1x1xf32>
    %114 = vector.extract %113[0, 0, 0] : f32 from vector<1x1x1xf32>
    %115 = vector.broadcast %114 : f32 to vector<1x128xf32>
    %116 = arith.cmpf oeq, %108, %115 : vector<1x128xf32>
    %c128_i32_31 = arith.constant 128 : i32
    %117 = vector.broadcast %c128_i32_31 : i32 to vector<1x128xi32>
    %118 = arith.select %116, %18, %117 : vector<1x128xi1>, vector<1x128xi32>
    %119 = vector.shape_cast %118 : vector<1x128xi32> to vector<1x1x128xi32>
    %cst_32 = arith.constant dense<2147483647> : vector<1xi32>
    %120 = vector.multi_reduction <minsi>, %119, %cst_32 [1, 2] : vector<1x1x128xi32> to vector<1xi32>
    %121 = vector.shape_cast %120 : vector<1xi32> to vector<1x1x1xi32>
    %122 = vector.extract %121[0, 0, 0] : i32 from vector<1x1x1xi32>
    %123 = vector.broadcast %85 : i32 to vector<16x1xi32>
    %124 = arith.cmpi eq, %9, %123 : vector<16x1xi32>
    %125 = vector.broadcast %114 : f32 to vector<16x1xf32>
    %126 = arith.select %124, %125, %71 : vector<16x1xi1>, vector<16x1xf32>
    %127 = vector.broadcast %122 : i32 to vector<16x1xi32>
    %128 = arith.select %124, %127, %73 : vector<16x1xi1>, vector<16x1xi32>
    %c2_i32 = arith.constant 2 : i32
    %129 = vector.shape_cast %126 : vector<16x1xf32> to vector<1x16x1xf32>
    %cst_33 = arith.constant dense<0xFF800000> : vector<1xf32>
    %130 = vector.multi_reduction <maximumf>, %129, %cst_33 [1, 2] : vector<1x16x1xf32> to vector<1xf32>
    %131 = vector.shape_cast %130 : vector<1xf32> to vector<1x1x1xf32>
    %132 = vector.extract %131[0, 0, 0] : f32 from vector<1x1x1xf32>
    %133 = vector.broadcast %132 : f32 to vector<16x1xf32>
    %134 = arith.cmpf oeq, %126, %133 : vector<16x1xf32>
    %c16_i32_34 = arith.constant 16 : i32
    %135 = vector.broadcast %c16_i32_34 : i32 to vector<16x1xi32>
    %136 = arith.select %134, %9, %135 : vector<16x1xi1>, vector<16x1xi32>
    %137 = vector.shape_cast %136 : vector<16x1xi32> to vector<1x16x1xi32>
    %cst_35 = arith.constant dense<2147483647> : vector<1xi32>
    %138 = vector.multi_reduction <minsi>, %137, %cst_35 [1, 2] : vector<1x16x1xi32> to vector<1xi32>
    %139 = vector.shape_cast %138 : vector<1xi32> to vector<1x1x1xi32>
    %140 = vector.extract %139[0, 0, 0] : i32 from vector<1x1x1xi32>
    %141 = vector.broadcast %140 : i32 to vector<16x1xi32>
    %142 = arith.cmpi eq, %9, %141 : vector<16x1xi32>
    %c128_i32_36 = arith.constant 128 : i32
    %143 = vector.broadcast %c128_i32_36 : i32 to vector<16x1xi32>
    %144 = arith.select %142, %128, %143 : vector<16x1xi1>, vector<16x1xi32>
    %145 = vector.shape_cast %144 : vector<16x1xi32> to vector<1x16x1xi32>
    %cst_37 = arith.constant dense<2147483647> : vector<1xi32>
    %146 = vector.multi_reduction <minsi>, %145, %cst_37 [1, 2] : vector<1x16x1xi32> to vector<1xi32>
    %147 = vector.shape_cast %146 : vector<1xi32> to vector<1x1x1xi32>
    %148 = vector.extract %147[0, 0, 0] : i32 from vector<1x1x1xi32>
    %cst_38 = arith.constant 2.000000e+00 : f32
    %149 = arith.mulf %cst_38, %132 : f32
    %cst_39 = arith.constant 2.000000e+00 : f32
    %150 = arith.subf %149, %cst_39 : f32
    %151 = math.exp %150 : f32
    %152 = arith.index_cast %c2_i32 : i32 to index
    %153 = memref.load %arg4[%152] : memref<8xf32, #tpu.memory_space<smem>>
    memref.store %151, %arg4[%152] : memref<8xf32, #tpu.memory_space<smem>>
    %154 = arith.index_cast %c2_i32 : i32 to index
    %155 = memref.load %arg2[%154] : memref<8xi32, #tpu.memory_space<smem>>
    memref.store %140, %arg2[%154] : memref<8xi32, #tpu.memory_space<smem>>
    %156 = arith.index_cast %c2_i32 : i32 to index
    %157 = memref.load %arg3[%156] : memref<8xi32, #tpu.memory_space<smem>>
    memref.store %148, %arg3[%156] : memref<8xi32, #tpu.memory_space<smem>>
    %158 = arith.index_cast %140 : i32 to index
    %c0_40 = arith.constant 0 : index
    %159 = vector.load %arg5[%158, %c0_40] : memref<16x128xf32, #tpu.memory_space<vmem>>, vector<1x128xf32>
    %160 = vector.broadcast %148 : i32 to vector<1x128xi32>
    %161 = arith.cmpi eq, %18, %160 : vector<1x128xi32>
    %162 = vector.broadcast %cst_8 : f32 to vector<1x128xf32>
    %163 = arith.select %161, %162, %159 : vector<1x128xi1>, vector<1x128xf32>
    %164 = arith.index_cast %140 : i32 to index
    %c0_41 = arith.constant 0 : index
    %165 = vector.load %arg5[%164, %c0_41] : memref<16x128xf32, #tpu.memory_space<vmem>>, vector<1x128xf32>
    tpu.vector_store %arg5[%164, %c0_41], %163 {strides = array<i32>} : memref<16x128xf32, #tpu.memory_space<vmem>>, vector<1x128xf32>,
    %166 = vector.shape_cast %163 : vector<1x128xf32> to vector<1x1x128xf32>
    %cst_42 = arith.constant dense<0xFF800000> : vector<1xf32>
    %167 = vector.multi_reduction <maximumf>, %166, %cst_42 [1, 2] : vector<1x1x128xf32> to vector<1xf32>
    %168 = vector.shape_cast %167 : vector<1xf32> to vector<1x1x1xf32>
    %169 = vector.extract %168[0, 0, 0] : f32 from vector<1x1x1xf32>
    %170 = vector.broadcast %169 : f32 to vector<1x128xf32>
    %171 = arith.cmpf oeq, %163, %170 : vector<1x128xf32>
    %c128_i32_43 = arith.constant 128 : i32
    %172 = vector.broadcast %c128_i32_43 : i32 to vector<1x128xi32>
    %173 = arith.select %171, %18, %172 : vector<1x128xi1>, vector<1x128xi32>
    %174 = vector.shape_cast %173 : vector<1x128xi32> to vector<1x1x128xi32>
    %cst_44 = arith.constant dense<2147483647> : vector<1xi32>
    %175 = vector.multi_reduction <minsi>, %174, %cst_44 [1, 2] : vector<1x1x128xi32> to vector<1xi32>
    %176 = vector.shape_cast %175 : vector<1xi32> to vector<1x1x1xi32>
    %177 = vector.extract %176[0, 0, 0] : i32 from vector<1x1x1xi32>
    %178 = vector.broadcast %140 : i32 to vector<16x1xi32>
    %179 = arith.cmpi eq, %9, %178 : vector<16x1xi32>
    %180 = vector.broadcast %169 : f32 to vector<16x1xf32>
    %181 = arith.select %179, %180, %126 : vector<16x1xi1>, vector<16x1xf32>
    %182 = vector.broadcast %177 : i32 to vector<16x1xi32>
    %183 = arith.select %179, %182, %128 : vector<16x1xi1>, vector<16x1xi32>
    %c3_i32 = arith.constant 3 : i32
    %184 = vector.shape_cast %181 : vector<16x1xf32> to vector<1x16x1xf32>
    %cst_45 = arith.constant dense<0xFF800000> : vector<1xf32>
    %185 = vector.multi_reduction <maximumf>, %184, %cst_45 [1, 2] : vector<1x16x1xf32> to vector<1xf32>
    %186 = vector.shape_cast %185 : vector<1xf32> to vector<1x1x1xf32>
    %187 = vector.extract %186[0, 0, 0] : f32 from vector<1x1x1xf32>
    %188 = vector.broadcast %187 : f32 to vector<16x1xf32>
    %189 = arith.cmpf oeq, %181, %188 : vector<16x1xf32>
    %c16_i32_46 = arith.constant 16 : i32
    %190 = vector.broadcast %c16_i32_46 : i32 to vector<16x1xi32>
    %191 = arith.select %189, %9, %190 : vector<16x1xi1>, vector<16x1xi32>
    %192 = vector.shape_cast %191 : vector<16x1xi32> to vector<1x16x1xi32>
    %cst_47 = arith.constant dense<2147483647> : vector<1xi32>
    %193 = vector.multi_reduction <minsi>, %192, %cst_47 [1, 2] : vector<1x16x1xi32> to vector<1xi32>
    %194 = vector.shape_cast %193 : vector<1xi32> to vector<1x1x1xi32>
    %195 = vector.extract %194[0, 0, 0] : i32 from vector<1x1x1xi32>
    %196 = vector.broadcast %195 : i32 to vector<16x1xi32>
    %197 = arith.cmpi eq, %9, %196 : vector<16x1xi32>
    %c128_i32_48 = arith.constant 128 : i32
    %198 = vector.broadcast %c128_i32_48 : i32 to vector<16x1xi32>
    %199 = arith.select %197, %183, %198 : vector<16x1xi1>, vector<16x1xi32>
    %200 = vector.shape_cast %199 : vector<16x1xi32> to vector<1x16x1xi32>
    %cst_49 = arith.constant dense<2147483647> : vector<1xi32>
    %201 = vector.multi_reduction <minsi>, %200, %cst_49 [1, 2] : vector<1x16x1xi32> to vector<1xi32>
    %202 = vector.shape_cast %201 : vector<1xi32> to vector<1x1x1xi32>
    %203 = vector.extract %202[0, 0, 0] : i32 from vector<1x1x1xi32>
    %cst_50 = arith.constant 2.000000e+00 : f32
    %204 = arith.mulf %cst_50, %187 : f32
    %cst_51 = arith.constant 2.000000e+00 : f32
    %205 = arith.subf %204, %cst_51 : f32
    %206 = math.exp %205 : f32
    %207 = arith.index_cast %c3_i32 : i32 to index
    %208 = memref.load %arg4[%207] : memref<8xf32, #tpu.memory_space<smem>>
    memref.store %206, %arg4[%207] : memref<8xf32, #tpu.memory_space<smem>>
    %209 = arith.index_cast %c3_i32 : i32 to index
    %210 = memref.load %arg2[%209] : memref<8xi32, #tpu.memory_space<smem>>
    memref.store %195, %arg2[%209] : memref<8xi32, #tpu.memory_space<smem>>
    %211 = arith.index_cast %c3_i32 : i32 to index
    %212 = memref.load %arg3[%211] : memref<8xi32, #tpu.memory_space<smem>>
    memref.store %203, %arg3[%211] : memref<8xi32, #tpu.memory_space<smem>>
    %213 = arith.index_cast %195 : i32 to index
    %c0_52 = arith.constant 0 : index
    %214 = vector.load %arg5[%213, %c0_52] : memref<16x128xf32, #tpu.memory_space<vmem>>, vector<1x128xf32>
    %215 = vector.broadcast %203 : i32 to vector<1x128xi32>
    %216 = arith.cmpi eq, %18, %215 : vector<1x128xi32>
    %217 = vector.broadcast %cst_8 : f32 to vector<1x128xf32>
    %218 = arith.select %216, %217, %214 : vector<1x128xi1>, vector<1x128xf32>
    %219 = arith.index_cast %195 : i32 to index
    %c0_53 = arith.constant 0 : index
    %220 = vector.load %arg5[%219, %c0_53] : memref<16x128xf32, #tpu.memory_space<vmem>>, vector<1x128xf32>
    tpu.vector_store %arg5[%219, %c0_53], %218 {strides = array<i32>} : memref<16x128xf32, #tpu.memory_space<vmem>>, vector<1x128xf32>,
    %221 = vector.shape_cast %218 : vector<1x128xf32> to vector<1x1x128xf32>
    %cst_54 = arith.constant dense<0xFF800000> : vector<1xf32>
    %222 = vector.multi_reduction <maximumf>, %221, %cst_54 [1, 2] : vector<1x1x128xf32> to vector<1xf32>
    %223 = vector.shape_cast %222 : vector<1xf32> to vector<1x1x1xf32>
    %224 = vector.extract %223[0, 0, 0] : f32 from vector<1x1x1xf32>
    %225 = vector.broadcast %224 : f32 to vector<1x128xf32>
    %226 = arith.cmpf oeq, %218, %225 : vector<1x128xf32>
    %c128_i32_55 = arith.constant 128 : i32
    %227 = vector.broadcast %c128_i32_55 : i32 to vector<1x128xi32>
    %228 = arith.select %226, %18, %227 : vector<1x128xi1>, vector<1x128xi32>
    %229 = vector.shape_cast %228 : vector<1x128xi32> to vector<1x1x128xi32>
    %cst_56 = arith.constant dense<2147483647> : vector<1xi32>
    %230 = vector.multi_reduction <minsi>, %229, %cst_56 [1, 2] : vector<1x1x128xi32> to vector<1xi32>
    %231 = vector.shape_cast %230 : vector<1xi32> to vector<1x1x1xi32>
    %232 = vector.extract %231[0, 0, 0] : i32 from vector<1x1x1xi32>
    %233 = vector.broadcast %195 : i32 to vector<16x1xi32>
    %234 = arith.cmpi eq, %9, %233 : vector<16x1xi32>
    %235 = vector.broadcast %224 : f32 to vector<16x1xf32>
    %236 = arith.select %234, %235, %181 : vector<16x1xi1>, vector<16x1xf32>
    %237 = vector.broadcast %232 : i32 to vector<16x1xi32>
    %238 = arith.select %234, %237, %183 : vector<16x1xi1>, vector<16x1xi32>
    %c4_i32 = arith.constant 4 : i32
    %239 = vector.shape_cast %236 : vector<16x1xf32> to vector<1x16x1xf32>
    %cst_57 = arith.constant dense<0xFF800000> : vector<1xf32>
    %240 = vector.multi_reduction <maximumf>, %239, %cst_57 [1, 2] : vector<1x16x1xf32> to vector<1xf32>
    %241 = vector.shape_cast %240 : vector<1xf32> to vector<1x1x1xf32>
    %242 = vector.extract %241[0, 0, 0] : f32 from vector<1x1x1xf32>
    %243 = vector.broadcast %242 : f32 to vector<16x1xf32>
    %244 = arith.cmpf oeq, %236, %243 : vector<16x1xf32>
    %c16_i32_58 = arith.constant 16 : i32
    %245 = vector.broadcast %c16_i32_58 : i32 to vector<16x1xi32>
    %246 = arith.select %244, %9, %245 : vector<16x1xi1>, vector<16x1xi32>
    %247 = vector.shape_cast %246 : vector<16x1xi32> to vector<1x16x1xi32>
    %cst_59 = arith.constant dense<2147483647> : vector<1xi32>
    %248 = vector.multi_reduction <minsi>, %247, %cst_59 [1, 2] : vector<1x16x1xi32> to vector<1xi32>
    %249 = vector.shape_cast %248 : vector<1xi32> to vector<1x1x1xi32>
    %250 = vector.extract %249[0, 0, 0] : i32 from vector<1x1x1xi32>
    %251 = vector.broadcast %250 : i32 to vector<16x1xi32>
    %252 = arith.cmpi eq, %9, %251 : vector<16x1xi32>
    %c128_i32_60 = arith.constant 128 : i32
    %253 = vector.broadcast %c128_i32_60 : i32 to vector<16x1xi32>
    %254 = arith.select %252, %238, %253 : vector<16x1xi1>, vector<16x1xi32>
    %255 = vector.shape_cast %254 : vector<16x1xi32> to vector<1x16x1xi32>
    %cst_61 = arith.constant dense<2147483647> : vector<1xi32>
    %256 = vector.multi_reduction <minsi>, %255, %cst_61 [1, 2] : vector<1x16x1xi32> to vector<1xi32>
    %257 = vector.shape_cast %256 : vector<1xi32> to vector<1x1x1xi32>
    %258 = vector.extract %257[0, 0, 0] : i32 from vector<1x1x1xi32>
    %cst_62 = arith.constant 2.000000e+00 : f32
    %259 = arith.mulf %cst_62, %242 : f32
    %cst_63 = arith.constant 2.000000e+00 : f32
    %260 = arith.subf %259, %cst_63 : f32
    %261 = math.exp %260 : f32
    %262 = arith.index_cast %c4_i32 : i32 to index
    %263 = memref.load %arg4[%262] : memref<8xf32, #tpu.memory_space<smem>>
    memref.store %261, %arg4[%262] : memref<8xf32, #tpu.memory_space<smem>>
    %264 = arith.index_cast %c4_i32 : i32 to index
    %265 = memref.load %arg2[%264] : memref<8xi32, #tpu.memory_space<smem>>
    memref.store %250, %arg2[%264] : memref<8xi32, #tpu.memory_space<smem>>
    %266 = arith.index_cast %c4_i32 : i32 to index
    %267 = memref.load %arg3[%266] : memref<8xi32, #tpu.memory_space<smem>>
    memref.store %258, %arg3[%266] : memref<8xi32, #tpu.memory_space<smem>>
    %268 = arith.index_cast %250 : i32 to index
    %c0_64 = arith.constant 0 : index
    %269 = vector.load %arg5[%268, %c0_64] : memref<16x128xf32, #tpu.memory_space<vmem>>, vector<1x128xf32>
    %270 = vector.broadcast %258 : i32 to vector<1x128xi32>
    %271 = arith.cmpi eq, %18, %270 : vector<1x128xi32>
    %272 = vector.broadcast %cst_8 : f32 to vector<1x128xf32>
    %273 = arith.select %271, %272, %269 : vector<1x128xi1>, vector<1x128xf32>
    %274 = arith.index_cast %250 : i32 to index
    %c0_65 = arith.constant 0 : index
    %275 = vector.load %arg5[%274, %c0_65] : memref<16x128xf32, #tpu.memory_space<vmem>>, vector<1x128xf32>
    tpu.vector_store %arg5[%274, %c0_65], %273 {strides = array<i32>} : memref<16x128xf32, #tpu.memory_space<vmem>>, vector<1x128xf32>,
    %276 = vector.shape_cast %273 : vector<1x128xf32> to vector<1x1x128xf32>
    %cst_66 = arith.constant dense<0xFF800000> : vector<1xf32>
    %277 = vector.multi_reduction <maximumf>, %276, %cst_66 [1, 2] : vector<1x1x128xf32> to vector<1xf32>
    %278 = vector.shape_cast %277 : vector<1xf32> to vector<1x1x1xf32>
    %279 = vector.extract %278[0, 0, 0] : f32 from vector<1x1x1xf32>
    %280 = vector.broadcast %279 : f32 to vector<1x128xf32>
    %281 = arith.cmpf oeq, %273, %280 : vector<1x128xf32>
    %c128_i32_67 = arith.constant 128 : i32
    %282 = vector.broadcast %c128_i32_67 : i32 to vector<1x128xi32>
    %283 = arith.select %281, %18, %282 : vector<1x128xi1>, vector<1x128xi32>
    %284 = vector.shape_cast %283 : vector<1x128xi32> to vector<1x1x128xi32>
    %cst_68 = arith.constant dense<2147483647> : vector<1xi32>
    %285 = vector.multi_reduction <minsi>, %284, %cst_68 [1, 2] : vector<1x1x128xi32> to vector<1xi32>
    %286 = vector.shape_cast %285 : vector<1xi32> to vector<1x1x1xi32>
    %287 = vector.extract %286[0, 0, 0] : i32 from vector<1x1x1xi32>
    %288 = vector.broadcast %250 : i32 to vector<16x1xi32>
    %289 = arith.cmpi eq, %9, %288 : vector<16x1xi32>
    %290 = vector.broadcast %279 : f32 to vector<16x1xf32>
    %291 = arith.select %289, %290, %236 : vector<16x1xi1>, vector<16x1xf32>
    %292 = vector.broadcast %287 : i32 to vector<16x1xi32>
    %293 = arith.select %289, %292, %238 : vector<16x1xi1>, vector<16x1xi32>
    %c5_i32 = arith.constant 5 : i32
    %294 = vector.shape_cast %291 : vector<16x1xf32> to vector<1x16x1xf32>
    %cst_69 = arith.constant dense<0xFF800000> : vector<1xf32>
    %295 = vector.multi_reduction <maximumf>, %294, %cst_69 [1, 2] : vector<1x16x1xf32> to vector<1xf32>
    %296 = vector.shape_cast %295 : vector<1xf32> to vector<1x1x1xf32>
    %297 = vector.extract %296[0, 0, 0] : f32 from vector<1x1x1xf32>
    %298 = vector.broadcast %297 : f32 to vector<16x1xf32>
    %299 = arith.cmpf oeq, %291, %298 : vector<16x1xf32>
    %c16_i32_70 = arith.constant 16 : i32
    %300 = vector.broadcast %c16_i32_70 : i32 to vector<16x1xi32>
    %301 = arith.select %299, %9, %300 : vector<16x1xi1>, vector<16x1xi32>
    %302 = vector.shape_cast %301 : vector<16x1xi32> to vector<1x16x1xi32>
    %cst_71 = arith.constant dense<2147483647> : vector<1xi32>
    %303 = vector.multi_reduction <minsi>, %302, %cst_71 [1, 2] : vector<1x16x1xi32> to vector<1xi32>
    %304 = vector.shape_cast %303 : vector<1xi32> to vector<1x1x1xi32>
    %305 = vector.extract %304[0, 0, 0] : i32 from vector<1x1x1xi32>
    %306 = vector.broadcast %305 : i32 to vector<16x1xi32>
    %307 = arith.cmpi eq, %9, %306 : vector<16x1xi32>
    %c128_i32_72 = arith.constant 128 : i32
    %308 = vector.broadcast %c128_i32_72 : i32 to vector<16x1xi32>
    %309 = arith.select %307, %293, %308 : vector<16x1xi1>, vector<16x1xi32>
    %310 = vector.shape_cast %309 : vector<16x1xi32> to vector<1x16x1xi32>
    %cst_73 = arith.constant dense<2147483647> : vector<1xi32>
    %311 = vector.multi_reduction <minsi>, %310, %cst_73 [1, 2] : vector<1x16x1xi32> to vector<1xi32>
    %312 = vector.shape_cast %311 : vector<1xi32> to vector<1x1x1xi32>
    %313 = vector.extract %312[0, 0, 0] : i32 from vector<1x1x1xi32>
    %cst_74 = arith.constant 2.000000e+00 : f32
    %314 = arith.mulf %cst_74, %297 : f32
    %cst_75 = arith.constant 2.000000e+00 : f32
    %315 = arith.subf %314, %cst_75 : f32
    %316 = math.exp %315 : f32
    %317 = arith.index_cast %c5_i32 : i32 to index
    %318 = memref.load %arg4[%317] : memref<8xf32, #tpu.memory_space<smem>>
    memref.store %316, %arg4[%317] : memref<8xf32, #tpu.memory_space<smem>>
    %319 = arith.index_cast %c5_i32 : i32 to index
    %320 = memref.load %arg2[%319] : memref<8xi32, #tpu.memory_space<smem>>
    memref.store %305, %arg2[%319] : memref<8xi32, #tpu.memory_space<smem>>
    %321 = arith.index_cast %c5_i32 : i32 to index
    %322 = memref.load %arg3[%321] : memref<8xi32, #tpu.memory_space<smem>>
    memref.store %313, %arg3[%321] : memref<8xi32, #tpu.memory_space<smem>>
    %323 = arith.index_cast %305 : i32 to index
    %c0_76 = arith.constant 0 : index
    %324 = vector.load %arg5[%323, %c0_76] : memref<16x128xf32, #tpu.memory_space<vmem>>, vector<1x128xf32>
    %325 = vector.broadcast %313 : i32 to vector<1x128xi32>
    %326 = arith.cmpi eq, %18, %325 : vector<1x128xi32>
    %327 = vector.broadcast %cst_8 : f32 to vector<1x128xf32>
    %328 = arith.select %326, %327, %324 : vector<1x128xi1>, vector<1x128xf32>
    %329 = arith.index_cast %305 : i32 to index
    %c0_77 = arith.constant 0 : index
    %330 = vector.load %arg5[%329, %c0_77] : memref<16x128xf32, #tpu.memory_space<vmem>>, vector<1x128xf32>
    tpu.vector_store %arg5[%329, %c0_77], %328 {strides = array<i32>} : memref<16x128xf32, #tpu.memory_space<vmem>>, vector<1x128xf32>,
    %331 = vector.shape_cast %328 : vector<1x128xf32> to vector<1x1x128xf32>
    %cst_78 = arith.constant dense<0xFF800000> : vector<1xf32>
    %332 = vector.multi_reduction <maximumf>, %331, %cst_78 [1, 2] : vector<1x1x128xf32> to vector<1xf32>
    %333 = vector.shape_cast %332 : vector<1xf32> to vector<1x1x1xf32>
    %334 = vector.extract %333[0, 0, 0] : f32 from vector<1x1x1xf32>
    %335 = vector.broadcast %334 : f32 to vector<1x128xf32>
    %336 = arith.cmpf oeq, %328, %335 : vector<1x128xf32>
    %c128_i32_79 = arith.constant 128 : i32
    %337 = vector.broadcast %c128_i32_79 : i32 to vector<1x128xi32>
    %338 = arith.select %336, %18, %337 : vector<1x128xi1>, vector<1x128xi32>
    %339 = vector.shape_cast %338 : vector<1x128xi32> to vector<1x1x128xi32>
    %cst_80 = arith.constant dense<2147483647> : vector<1xi32>
    %340 = vector.multi_reduction <minsi>, %339, %cst_80 [1, 2] : vector<1x1x128xi32> to vector<1xi32>
    %341 = vector.shape_cast %340 : vector<1xi32> to vector<1x1x1xi32>
    %342 = vector.extract %341[0, 0, 0] : i32 from vector<1x1x1xi32>
    %343 = vector.broadcast %305 : i32 to vector<16x1xi32>
    %344 = arith.cmpi eq, %9, %343 : vector<16x1xi32>
    %345 = vector.broadcast %334 : f32 to vector<16x1xf32>
    %346 = arith.select %344, %345, %291 : vector<16x1xi1>, vector<16x1xf32>
    %347 = vector.broadcast %342 : i32 to vector<16x1xi32>
    %348 = arith.select %344, %347, %293 : vector<16x1xi1>, vector<16x1xi32>
    %c6_i32 = arith.constant 6 : i32
    %349 = vector.shape_cast %346 : vector<16x1xf32> to vector<1x16x1xf32>
    %cst_81 = arith.constant dense<0xFF800000> : vector<1xf32>
    %350 = vector.multi_reduction <maximumf>, %349, %cst_81 [1, 2] : vector<1x16x1xf32> to vector<1xf32>
    %351 = vector.shape_cast %350 : vector<1xf32> to vector<1x1x1xf32>
    %352 = vector.extract %351[0, 0, 0] : f32 from vector<1x1x1xf32>
    %353 = vector.broadcast %352 : f32 to vector<16x1xf32>
    %354 = arith.cmpf oeq, %346, %353 : vector<16x1xf32>
    %c16_i32_82 = arith.constant 16 : i32
    %355 = vector.broadcast %c16_i32_82 : i32 to vector<16x1xi32>
    %356 = arith.select %354, %9, %355 : vector<16x1xi1>, vector<16x1xi32>
    %357 = vector.shape_cast %356 : vector<16x1xi32> to vector<1x16x1xi32>
    %cst_83 = arith.constant dense<2147483647> : vector<1xi32>
    %358 = vector.multi_reduction <minsi>, %357, %cst_83 [1, 2] : vector<1x16x1xi32> to vector<1xi32>
    %359 = vector.shape_cast %358 : vector<1xi32> to vector<1x1x1xi32>
    %360 = vector.extract %359[0, 0, 0] : i32 from vector<1x1x1xi32>
    %361 = vector.broadcast %360 : i32 to vector<16x1xi32>
    %362 = arith.cmpi eq, %9, %361 : vector<16x1xi32>
    %c128_i32_84 = arith.constant 128 : i32
    %363 = vector.broadcast %c128_i32_84 : i32 to vector<16x1xi32>
    %364 = arith.select %362, %348, %363 : vector<16x1xi1>, vector<16x1xi32>
    %365 = vector.shape_cast %364 : vector<16x1xi32> to vector<1x16x1xi32>
    %cst_85 = arith.constant dense<2147483647> : vector<1xi32>
    %366 = vector.multi_reduction <minsi>, %365, %cst_85 [1, 2] : vector<1x16x1xi32> to vector<1xi32>
    %367 = vector.shape_cast %366 : vector<1xi32> to vector<1x1x1xi32>
    %368 = vector.extract %367[0, 0, 0] : i32 from vector<1x1x1xi32>
    %cst_86 = arith.constant 2.000000e+00 : f32
    %369 = arith.mulf %cst_86, %352 : f32
    %cst_87 = arith.constant 2.000000e+00 : f32
    %370 = arith.subf %369, %cst_87 : f32
    %371 = math.exp %370 : f32
    %372 = arith.index_cast %c6_i32 : i32 to index
    %373 = memref.load %arg4[%372] : memref<8xf32, #tpu.memory_space<smem>>
    memref.store %371, %arg4[%372] : memref<8xf32, #tpu.memory_space<smem>>
    %374 = arith.index_cast %c6_i32 : i32 to index
    %375 = memref.load %arg2[%374] : memref<8xi32, #tpu.memory_space<smem>>
    memref.store %360, %arg2[%374] : memref<8xi32, #tpu.memory_space<smem>>
    %376 = arith.index_cast %c6_i32 : i32 to index
    %377 = memref.load %arg3[%376] : memref<8xi32, #tpu.memory_space<smem>>
    memref.store %368, %arg3[%376] : memref<8xi32, #tpu.memory_space<smem>>
    %378 = arith.index_cast %360 : i32 to index
    %c0_88 = arith.constant 0 : index
    %379 = vector.load %arg5[%378, %c0_88] : memref<16x128xf32, #tpu.memory_space<vmem>>, vector<1x128xf32>
    %380 = vector.broadcast %368 : i32 to vector<1x128xi32>
    %381 = arith.cmpi eq, %18, %380 : vector<1x128xi32>
    %382 = vector.broadcast %cst_8 : f32 to vector<1x128xf32>
    %383 = arith.select %381, %382, %379 : vector<1x128xi1>, vector<1x128xf32>
    %384 = arith.index_cast %360 : i32 to index
    %c0_89 = arith.constant 0 : index
    %385 = vector.load %arg5[%384, %c0_89] : memref<16x128xf32, #tpu.memory_space<vmem>>, vector<1x128xf32>
    tpu.vector_store %arg5[%384, %c0_89], %383 {strides = array<i32>} : memref<16x128xf32, #tpu.memory_space<vmem>>, vector<1x128xf32>,
    %386 = vector.shape_cast %383 : vector<1x128xf32> to vector<1x1x128xf32>
    %cst_90 = arith.constant dense<0xFF800000> : vector<1xf32>
    %387 = vector.multi_reduction <maximumf>, %386, %cst_90 [1, 2] : vector<1x1x128xf32> to vector<1xf32>
    %388 = vector.shape_cast %387 : vector<1xf32> to vector<1x1x1xf32>
    %389 = vector.extract %388[0, 0, 0] : f32 from vector<1x1x1xf32>
    %390 = vector.broadcast %389 : f32 to vector<1x128xf32>
    %391 = arith.cmpf oeq, %383, %390 : vector<1x128xf32>
    %c128_i32_91 = arith.constant 128 : i32
    %392 = vector.broadcast %c128_i32_91 : i32 to vector<1x128xi32>
    %393 = arith.select %391, %18, %392 : vector<1x128xi1>, vector<1x128xi32>
    %394 = vector.shape_cast %393 : vector<1x128xi32> to vector<1x1x128xi32>
    %cst_92 = arith.constant dense<2147483647> : vector<1xi32>
    %395 = vector.multi_reduction <minsi>, %394, %cst_92 [1, 2] : vector<1x1x128xi32> to vector<1xi32>
    %396 = vector.shape_cast %395 : vector<1xi32> to vector<1x1x1xi32>
    %397 = vector.extract %396[0, 0, 0] : i32 from vector<1x1x1xi32>
    %398 = vector.broadcast %360 : i32 to vector<16x1xi32>
    %399 = arith.cmpi eq, %9, %398 : vector<16x1xi32>
    %400 = vector.broadcast %389 : f32 to vector<16x1xf32>
    %401 = arith.select %399, %400, %346 : vector<16x1xi1>, vector<16x1xf32>
    %402 = vector.broadcast %397 : i32 to vector<16x1xi32>
    %403 = arith.select %399, %402, %348 : vector<16x1xi1>, vector<16x1xi32>
    %c7_i32 = arith.constant 7 : i32
    %404 = vector.shape_cast %401 : vector<16x1xf32> to vector<1x16x1xf32>
    %cst_93 = arith.constant dense<0xFF800000> : vector<1xf32>
    %405 = vector.multi_reduction <maximumf>, %404, %cst_93 [1, 2] : vector<1x16x1xf32> to vector<1xf32>
    %406 = vector.shape_cast %405 : vector<1xf32> to vector<1x1x1xf32>
    %407 = vector.extract %406[0, 0, 0] : f32 from vector<1x1x1xf32>
    %408 = vector.broadcast %407 : f32 to vector<16x1xf32>
    %409 = arith.cmpf oeq, %401, %408 : vector<16x1xf32>
    %c16_i32_94 = arith.constant 16 : i32
    %410 = vector.broadcast %c16_i32_94 : i32 to vector<16x1xi32>
    %411 = arith.select %409, %9, %410 : vector<16x1xi1>, vector<16x1xi32>
    %412 = vector.shape_cast %411 : vector<16x1xi32> to vector<1x16x1xi32>
    %cst_95 = arith.constant dense<2147483647> : vector<1xi32>
    %413 = vector.multi_reduction <minsi>, %412, %cst_95 [1, 2] : vector<1x16x1xi32> to vector<1xi32>
    %414 = vector.shape_cast %413 : vector<1xi32> to vector<1x1x1xi32>
    %415 = vector.extract %414[0, 0, 0] : i32 from vector<1x1x1xi32>
    %416 = vector.broadcast %415 : i32 to vector<16x1xi32>
    %417 = arith.cmpi eq, %9, %416 : vector<16x1xi32>
    %c128_i32_96 = arith.constant 128 : i32
    %418 = vector.broadcast %c128_i32_96 : i32 to vector<16x1xi32>
    %419 = arith.select %417, %403, %418 : vector<16x1xi1>, vector<16x1xi32>
    %420 = vector.shape_cast %419 : vector<16x1xi32> to vector<1x16x1xi32>
    %cst_97 = arith.constant dense<2147483647> : vector<1xi32>
    %421 = vector.multi_reduction <minsi>, %420, %cst_97 [1, 2] : vector<1x16x1xi32> to vector<1xi32>
    %422 = vector.shape_cast %421 : vector<1xi32> to vector<1x1x1xi32>
    %423 = vector.extract %422[0, 0, 0] : i32 from vector<1x1x1xi32>
    %cst_98 = arith.constant 2.000000e+00 : f32
    %424 = arith.mulf %cst_98, %407 : f32
    %cst_99 = arith.constant 2.000000e+00 : f32
    %425 = arith.subf %424, %cst_99 : f32
    %426 = math.exp %425 : f32
    %427 = arith.index_cast %c7_i32 : i32 to index
    %428 = memref.load %arg4[%427] : memref<8xf32, #tpu.memory_space<smem>>
    memref.store %426, %arg4[%427] : memref<8xf32, #tpu.memory_space<smem>>
    %429 = arith.index_cast %c7_i32 : i32 to index
    %430 = memref.load %arg2[%429] : memref<8xi32, #tpu.memory_space<smem>>
    memref.store %415, %arg2[%429] : memref<8xi32, #tpu.memory_space<smem>>
    %431 = arith.index_cast %c7_i32 : i32 to index
    %432 = memref.load %arg3[%431] : memref<8xi32, #tpu.memory_space<smem>>
    memref.store %423, %arg3[%431] : memref<8xi32, #tpu.memory_space<smem>>
    %433 = arith.index_cast %415 : i32 to index
    %c0_100 = arith.constant 0 : index
    %434 = vector.load %arg5[%433, %c0_100] : memref<16x128xf32, #tpu.memory_space<vmem>>, vector<1x128xf32>
    %435 = vector.broadcast %423 : i32 to vector<1x128xi32>
    %436 = arith.cmpi eq, %18, %435 : vector<1x128xi32>
    %437 = vector.broadcast %cst_8 : f32 to vector<1x128xf32>
    %438 = arith.select %436, %437, %434 : vector<1x128xi1>, vector<1x128xf32>
    %439 = arith.index_cast %415 : i32 to index
    %c0_101 = arith.constant 0 : index
    %440 = vector.load %arg5[%439, %c0_101] : memref<16x128xf32, #tpu.memory_space<vmem>>, vector<1x128xf32>
    tpu.vector_store %arg5[%439, %c0_101], %438 {strides = array<i32>} : memref<16x128xf32, #tpu.memory_space<vmem>>, vector<1x128xf32>,
    %441 = vector.shape_cast %438 : vector<1x128xf32> to vector<1x1x128xf32>
    %cst_102 = arith.constant dense<0xFF800000> : vector<1xf32>
    %442 = vector.multi_reduction <maximumf>, %441, %cst_102 [1, 2] : vector<1x1x128xf32> to vector<1xf32>
    %443 = vector.shape_cast %442 : vector<1xf32> to vector<1x1x1xf32>
    %444 = vector.extract %443[0, 0, 0] : f32 from vector<1x1x1xf32>
    %445 = vector.broadcast %444 : f32 to vector<1x128xf32>
    %446 = arith.cmpf oeq, %438, %445 : vector<1x128xf32>
    %c128_i32_103 = arith.constant 128 : i32
    %447 = vector.broadcast %c128_i32_103 : i32 to vector<1x128xi32>
    %448 = arith.select %446, %18, %447 : vector<1x128xi1>, vector<1x128xi32>
    %449 = vector.shape_cast %448 : vector<1x128xi32> to vector<1x1x128xi32>
    %cst_104 = arith.constant dense<2147483647> : vector<1xi32>
    %450 = vector.multi_reduction <minsi>, %449, %cst_104 [1, 2] : vector<1x1x128xi32> to vector<1xi32>
    %451 = vector.shape_cast %450 : vector<1xi32> to vector<1x1x1xi32>
    %452 = vector.extract %451[0, 0, 0] : i32 from vector<1x1x1xi32>
    %453 = vector.broadcast %415 : i32 to vector<16x1xi32>
    %454 = arith.cmpi eq, %9, %453 : vector<16x1xi32>
    %455 = vector.broadcast %444 : f32 to vector<16x1xf32>
    %456 = arith.select %454, %455, %401 : vector<16x1xi1>, vector<16x1xf32>
    %457 = vector.broadcast %452 : i32 to vector<16x1xi32>
    %458 = arith.select %454, %457, %403 : vector<16x1xi1>, vector<16x1xi32>
    %c8_i32 = arith.constant 8 : i32
    return
  }
}

</mosaic_0001>

<bundles_post_ra>
// kernel: tpu_custom_call.1
= control target key start
LH: loop header
LB: loop body
LE: loop exit
PB: predicated region body
PF: predicated region fallthrough
CT: control target
= control target key end

     0   :  { %10 = vsyncpa [#allocation4], 0  ;;  %vm34_vm0 = vcmask 261120   ;;  %s1849_s0 = inlined_call_operand.vmem [shape: f32[16,32], index: 0, kind: input, shape index: {}]   ;;  %s1850_s1 = inlined_call_operand.vmem [shape: f32[128,32], index: 1, kind: input, shape index: {}]   ;;  %s1851_s2 = inlined_call_operand.hbm [shape: s32[8], index: 2, kind: output, shape index: {0}]   ;;  %s1852_s3 = inlined_call_operand.hbm [shape: s32[8], index: 3, kind: output, shape index: {1}]   ;;  %s1853_s4 = inlined_call_operand.hbm [shape: f32[8], index: 4, kind: output, shape index: {2}]  }
   0x1   :  { %v18_v0 = vld [vmem:[%s1850_s1] sm:$0xff]  ;;  %v19_v1 = vld [vmem:[%s1850_s1 + $0x8] sm:$0xff]  ;;  %v20_v2 = vld [vmem:[%s1850_s1 + $0x10] sm:$0xff] }
   0x2   :  { %v1115_v3 = vpack.c.bf16 %v19_v1, %v18_v0  ;;  %vm1347_vm1 = vmpackc.low %vm34_vm0, %vm34_vm0  ;;  %v21_v5 = vld [vmem:[%s1850_s1 + $0x18] sm:$0xff]  ;;  %v16_v7 = vld [vmem:[%s1849_s0] sm:$0xff] }
   0x3   :  { %v1121_v6 = vpack.c.bf16 %v21_v5, %v20_v2  ;;  %v22_v8 = vld [vmem:[%s1850_s1 + $0x20] sm:$0xff]  ;;  %v23_v9 = vld [vmem:[%s1850_s1 + $0x28] sm:$0xff]  ;;  %1112 = vmatprep.mubr.msk.f32.mxu0 %vm34_vm0, %v16_v7 }
   0x4   :  { %1117 = vmatprep.subr.msk.bf16.mxu0 %vm1347_vm1, %v1115_v3 }
   0x5   :  { %1120 = vmatpush3.bf16.xpose.msk.msra.mxu0 %vm1347_vm1, %v1115_v3 }
   0x6   :  { %1123 = vmatprep.subr.msk.bf16.mxu0 %vm1347_vm1, %v1121_v6 }
   0x7   :  { %11 = vsyncpa [#allocation6], 0  ;;  %v1127_v10 = vpack.c.bf16 %v23_v9, %v22_v8  ;;  %v24_v11 = vld [vmem:[%s1850_s1 + $0x30] sm:$0xff]  ;;  %v25_v12 = vld [vmem:[%s1850_s1 + $0x38] sm:$0xff]  ;;  %v164_v27 = vlaneseq }
   0x8   :  { %v1133_v13 = vpack.c.bf16 %v25_v12, %v24_v11  ;;  %v26_v14 = vld [vmem:[%s1850_s1 + $0x40] sm:$0xff]  ;;  %v27_v15 = vld [vmem:[%s1850_s1 + $0x48] sm:$0xff]  ;;  %v28_v17 = vld [vmem:[%s1850_s1 + $0x50] sm:$0xff] }
   0x9   :  { %v1139_v16 = vpack.c.bf16 %v27_v15, %v26_v14  ;;  %v29_v18 = vld [vmem:[%s1850_s1 + $0x58] sm:$0xff]  ;;  %v30_v20 = vld [vmem:[%s1850_s1 + $0x60] sm:$0xff]  ;;  %v31_v21 = vld [vmem:[%s1850_s1 + $0x68] sm:$0xff]  ;;  %v1430_v28 = vand.u32 127, %v164_v27  ;;  %v1443_v48 = vshrl.u32 %v164_v27, 7 }
   0xa   :  { %v1145_v19 = vpack.c.bf16 %v29_v18, %v28_v17  ;;  %v1151_v22 = vpack.c.bf16 %v31_v21, %v30_v20  ;;  %v32_v23 = vld [vmem:[%s1850_s1 + $0x70] sm:$0xff]  ;;  %v33_v24 = vld [vmem:[%s1850_s1 + $0x78] sm:$0xff]  ;;  %v17_v26 = vld [vmem:[%s1849_s0 + $0x8] sm:$0xff] }
   0xb   :  { %v1157_v25 = vpack.c.bf16 %v33_v24, %v32_v23  ;;  %vm166_vm2 = vcmp.ge.s32.totalorder %v1430_v28, 16  ;;  %v1446_v49 = vadd.s32 8, %v1443_v48 }
   0xd   :  { %1126 = vmatpush3.bf16.xpose.msk.msra.mxu0 %vm1347_vm1, %v1121_v6 }
   0xe   :  { %1129 = vmatprep.subr.msk.bf16.mxu0 %vm1347_vm1, %v1127_v10 }
  0x15   :  { %1132 = vmatpush3.bf16.xpose.msk.msra.mxu0 %vm1347_vm1, %v1127_v10 }
  0x16   :  { %1135 = vmatprep.subr.msk.bf16.mxu0 %vm1347_vm1, %v1133_v13 }
  0x1d   :  { %1138 = vmatpush3.bf16.xpose.msk.msra.mxu0 %vm1347_vm1, %v1133_v13 }
  0x1e   :  { %1141 = vmatprep.subr.msk.bf16.mxu0 %vm1347_vm1, %v1139_v16 }
  0x25   :  { %1144 = vmatpush3.bf16.xpose.msk.msra.mxu0 %vm1347_vm1, %v1139_v16 }
  0x26   :  { %1147 = vmatprep.subr.msk.bf16.mxu0 %vm1347_vm1, %v1145_v19 }
  0x2d   :  { %1150 = vmatpush3.bf16.xpose.msk.msra.mxu0 %vm1347_vm1, %v1145_v19 }
  0x2e   :  { %1153 = vmatprep.subr.msk.bf16.mxu0 %vm1347_vm1, %v1151_v22 }
  0x35   :  { %1156 = vmatpush3.bf16.xpose.msk.msra.mxu0 %vm1347_vm1, %v1151_v22 }
  0x36   :  { %1159 = vmatprep.subr.msk.bf16.mxu0 %vm1347_vm1, %v1157_v25 }
  0x3d   :  { %1162 = vmatpush3.bf16.xpose.msk.msra.mxu0 %vm1347_vm1, %v1157_v25 }
  0x44   :  { %1113 = vmatmul.mubr.msk.f32.vlgmr.msra.gmra.mrb[0].mxu0 %vm34_vm0, %v17_v26 }
 0x117   :  { %v1114_v29 = vpop.f32.mrb[0].mxu0 }
 0x118   :  { %v168_v30 = vsel %vm166_vm2, -inf, %v1114_v29  ;;  %v155_v31 = vpop.f32.mrb[1].mxu0 }
 0x119   :  { %170 = vst [vmem:[#allocation2 + $0x8] sm:$0xff] %v168_v30  ;;  %v167_v32 = vsel %vm166_vm2, -inf, %v155_v31 }
 0x11a   :  { %169 = vst [vmem:[#allocation2] sm:$0xff] %v167_v32  ;;  %174 = vmax.xlane.f32.xlu0 %v167_v32 }
 0x11e   :  { %176 = vmax.xlane.f32.xlu0 %v168_v30 }
 0x1a7   :  { %v1433_v33 = vpop.xlane.xlu0 %174 }
 0x1a8   :  { %vm178_vm3 = vcmp.eq.f32.partialorder %v167_v32, %v1433_v33 }
 0x1a9   :  { %v180_v34 = vsel %vm178_vm3, %v1430_v28, 128  ;;  %vm270_vm3 = vcmask 1040384  }
 0x1aa   :  { %v183_v35 = vshra.s32 %v180_v34, 16  ;;  %v182_v60 = vand.u32 65535, %v180_v34 }
 0x1ab   :  { %v1437_v36 = vpop.xlane.xlu0 %176 }
 0x1ac   :  { %v210_v37 = vmax.f32 %v1433_v33, %v1437_v36  ;;  %v185_v38 = vcvt.s32.f32 %v183_v35  ;;  %vm179_vm4 = vcmp.eq.f32.partialorder %v168_v30, %v1437_v36  ;;  %v184_v62 = vcvt.s32.f32 %v182_v60 }
 0x1ad   :  { %v181_v39 = vsel %vm179_vm4, %v1430_v28, 128 }
 0x1ae   :  { %186 = vmin.xlane.f32.xlu1 %v185_v38  ;;  %v197_v40 = vshra.s32 %v181_v39, 16  ;;  %v211_v41 = vrot.slane %v210_v37, 4  ;;  %v196_v63 = vand.u32 65535, %v181_v39 }
 0x1b0   :  { %v199_v42 = vcvt.s32.f32 %v197_v40  ;;  %v212_v43 = vmax.f32 %v210_v37, %v211_v41  ;;  %v198_v2 = vcvt.s32.f32 %v196_v63 }
 0x1b2   :  { %200 = vmin.xlane.f32.xlu1 %v199_v42  ;;  %v213_v44 = vrot.slane %v212_v43, 2 }
 0x1b4   :  { %v214_v45 = vmax.f32 %v212_v43, %v213_v44 }
 0x1b6   :  { %v215_v46 = vrot.slane %v214_v45, 1 }
 0x1b8   :  { %v216_v47 = vmax.f32 %v214_v45, %v215_v46 }
 0x1ba   :  { %1163 = vpush %v216_v47 }
 0x1eb   :  { %s1448_s0 = spop %1163 }
 0x1ec   :  { %v218_v50 = vstv %s1448_s0  ;;  %s252_s25 = smul.f32 2.0, %s1448_s0 }
 0x1ed   :  { %vm219_vm5 = vcmp.eq.f32.partialorder %v1433_v33, %v218_v50  ;;  %vm220_vm6 = vcmp.eq.f32.partialorder %v1437_v36, %v218_v50 }
 0x1ee   :  { %v221_v51 = vsel %vm219_vm5, %v1443_v48, 16  ;;  %v222_v52 = vsel %vm220_vm6, %v1446_v49, 16  ;;  %s1054_s26 = sadd.f32 -2.0, %s252_s25 }
 0x1ef   :  { %vm223_vm7 = vcmp.lt.s32.totalorder %v221_v51, %v222_v52 }
 0x1f0   :  { %v224_v53 = vsel %vm223_vm7, %v221_v51, %v222_v52  ;;  %v254_v14 = vstv %s1054_s26 }
 0x1f1   :  { %v225_v54 = vrot.slane %v224_v53, 4  ;;  %v255_v20 = vmul.f32 1.442695, %v254_v14 }
 0x1f3   :  { %vm226_vm8 = vcmp.lt.s32.totalorder %v224_v53, %v225_v54  ;;  %1258 = vpow2.f32 %v255_v20 }
 0x1f4   :  { %v227_v55 = vsel %vm226_vm8, %v224_v53, %v225_v54 }
 0x1f5   :  { %v228_v56 = vrot.slane %v227_v55, 2 }
 0x1f7   :  { %vm229_vm9 = vcmp.lt.s32.totalorder %v227_v55, %v228_v56 }
 0x1f8   :  { %v230_v57 = vsel %vm229_vm9, %v227_v55, %v228_v56 }
 0x1f9   :  { %v231_v58 = vrot.slane %v230_v57, 1 }
 0x1fb   :  { %vm232_vm10 = vcmp.lt.s32.totalorder %v230_v57, %v231_v58 }
 0x1fc   :  { %v233_v59 = vsel %vm232_vm10, %v230_v57, %v231_v58 }
 0x1fd   :  { %1165 = vpush %v233_v59  ;;  %v1259_v29 = vpop.eup %1258 }
 0x22e   :  { %s1455_s1 = spop %1165 }
 0x22f   :  { %261 = sst [smem:[#allocation3]] %s1455_s1  ;;  %v235_v10 = vstv %s1455_s1  ;;  %s264_s29 = scalar_lea.vmem [#allocation2], %s1455_s1 }
 0x230   :  { %vm1465_vm13 = vcmp.eq.s32.totalorder %v1443_v48, %v235_v10  ;;  %vm1470_vm14 = vcmp.eq.s32.totalorder %v1446_v49, %v235_v10  ;;  %v265_v31 = vld [vmem:[%s264_s29] sm:$0x1] }
 0x23b   :  { %v187_v61 = vpop.xlane.xlu1 %186 }
 0x23c   :  { %vm188_vm11 = vcmp.eq.f32.partialorder %v185_v38, %v187_v61  ;;  %v193_v4 = vcvt.f32.s32 %v187_v61 }
 0x23d   :  { %v189_v0 = vsel %vm188_vm11, %v184_v62, inf }
 0x23e   :  { %190 = vmin.xlane.f32.xlu0 %v189_v0  ;;  %v194_v8 = vshll.u32 %v193_v4, 16 }
 0x23f   :  { %v201_v1 = vpop.xlane.xlu1 %200 }
 0x240   :  { %vm202_vm12 = vcmp.eq.f32.partialorder %v199_v42, %v201_v1  ;;  %v207_v6 = vcvt.f32.s32 %v201_v1 }
 0x241   :  { %v203_v3 = vsel %vm202_vm12, %v198_v2, inf }
 0x242   :  { %204 = vmin.xlane.f32.xlu1 %v203_v3  ;;  %v208_v11 = vshll.u32 %v207_v6, 16 }
 0x2cb   :  { %v191_v5 = vpop.xlane.xlu0 %190 }
 0x2cc   :  { %v192_v7 = vcvt.f32.s32 %v191_v5 }
 0x2ce   :  { %v1460_v12 = vadd.s32 %v194_v8, %v192_v7 }
 0x2cf   :  { %v205_v9 = vpop.xlane.xlu1 %204 }
 0x2d0   :  { %v206_v13 = vcvt.f32.s32 %v205_v9  ;;  %v238_v18 = vsel %vm1465_vm13, %v1460_v12, 128 }
 0x2d2   :  { %v1462_v15 = vadd.s32 %v208_v11, %v206_v13 }
 0x2d4   :  { %v239_v19 = vsel %vm1470_vm14, %v1462_v15, 128 }
 0x2d5   :  { %vm240_vm15 = vcmp.lt.s32.totalorder %v238_v18, %v239_v19 }
 0x2d6   :  { %v241_v21 = vsel %vm240_vm15, %v238_v18, %v239_v19 }
 0x2d7   :  { %v242_v22 = vrot.slane %v241_v21, 4 }
 0x2d9   :  { %vm243_vm0 = vcmp.lt.s32.totalorder %v241_v21, %v242_v22 }
 0x2da   :  { %v244_v23 = vsel %vm243_vm0, %v241_v21, %v242_v22 }
 0x2db   :  { %v245_v24 = vrot.slane %v244_v23, 2 }
 0x2dd   :  { %vm246_vm1 = vcmp.lt.s32.totalorder %v244_v23, %v245_v24 }
 0x2de   :  { %v247_v25 = vsel %vm246_vm1, %v244_v23, %v245_v24 }
 0x2df   :  { %v248_v26 = vrot.slane %v247_v25, 1 }
 0x2e1   :  { %vm249_vm2 = vcmp.lt.s32.totalorder %v247_v25, %v248_v26 }
 0x2e2   :  { %v250_v27 = vsel %vm249_vm2, %v247_v25, %v248_v26 }
 0x2e3   :  { %1167 = vpush %v250_v27 }
 0x2e4   :  { %1169 = vpush %v1259_v29 }
 0x314   :  { %s1168_s27 = spop %1167 }
 0x315   :  { %263 = sst [smem:[#allocation5]] %s1168_s27  ;;  %v266_v30 = vstv %s1168_s27  ;;  %s1170_s28 = spop %1169 }
 0x316   :  { %vm267_vm4 = vcmp.eq.s32.totalorder %v1430_v28, %v266_v30  ;;  %259 = sst [smem:[#allocation7]] %s1170_s28 }
 0x317   :  { %v268_v32 = vsel %vm267_vm4, -inf, %v265_v31 }
 0x318   :  { %v271_v34 = vsel %vm270_vm3, %v268_v32, -inf  ;;  %269 = vst [vmem:[%s264_s29] sm:$0x1] %v268_v32 }
 0x319   :  { %272 = vmax.xlane.f32.xlu0 %v271_v34 }
 0x3a6   :  { %v273_v35 = vpop.xlane.xlu0 %272 }
 0x3a7   :  { %v274_v37 = vrot.slane %v273_v35, 4 }
 0x3a9   :  { %v275_v38 = vmax.f32 %v273_v35, %v274_v37 }
 0x3ab   :  { %v276_v39 = vrot.slane %v275_v38, 2 }
 0x3ad   :  { %v277_v40 = vmax.f32 %v275_v38, %v276_v39 }
 0x3af   :  { %v278_v41 = vrot.slane %v277_v40, 1 }
 0x3b1   :  { %v279_v42 = vmax.f32 %v277_v40, %v278_v41 }
 0x3b3   :  { %1171 = vpush %v279_v42 }
 0x3e4   :  { %s1172_s30 = spop %1171 }
 0x3e5   :  { %v281_v43 = vstv %s1172_s30 }
 0x3e6   :  { %vm282_vm5 = vcmp.eq.f32.partialorder %v268_v32, %v281_v43  ;;  %v1488_v54 = vsel %vm1465_vm13, %v281_v43, %v1433_v33  ;;  %v1493_v55 = vsel %vm1470_vm14, %v281_v43, %v1437_v36 }
 0x3e7   :  { %v283_v44 = vsel %vm282_vm5, %v1430_v28, 128  ;;  %v314_v56 = vmax.f32 %v1488_v54, %v1493_v55 }
 0x3e8   :  { %v284_v45 = vsel %vm270_vm3, %v283_v44, 2147483647 }
 0x3e9   :  { %v286_v46 = vshra.s32 %v284_v45, 16  ;;  %v285_v50 = vand.u32 65535, %v284_v45  ;;  %v315_v57 = vrot.slane %v314_v56, 4 }
 0x3eb   :  { %v288_v47 = vcvt.s32.f32 %v286_v46  ;;  %v287_v52 = vcvt.s32.f32 %v285_v50  ;;  %v316_v60 = vmax.f32 %v314_v56, %v315_v57 }
 0x3ed   :  { %289 = vmin.xlane.f32.xlu1 %v288_v47  ;;  %v317_v0 = vrot.slane %v316_v60, 2 }
 0x3ef   :  { %v318_v2 = vmax.f32 %v316_v60, %v317_v0 }
 0x3f1   :  { %v319_v36 = vrot.slane %v318_v2, 1 }
 0x3f3   :  { %v320_v7 = vmax.f32 %v318_v2, %v319_v36 }
 0x47a   :  { %v290_v51 = vpop.xlane.xlu1 %289 }
 0x47b   :  { %vm291_vm6 = vcmp.eq.f32.partialorder %v288_v47, %v290_v51  ;;  %v296_v58 = vcvt.f32.s32 %v290_v51 }
 0x47c   :  { %v292_v53 = vsel %vm291_vm6, %v287_v52, inf }
 0x47d   :  { %293 = vmin.xlane.f32.xlu0 %v292_v53  ;;  %v297_v61 = vshll.u32 %v296_v58, 16 }
 0x50a   :  { %v294_v59 = vpop.xlane.xlu0 %293 }
 0x50b   :  { %v295_v62 = vcvt.f32.s32 %v294_v59 }
 0x50d   :  { %v298_v63 = vadd.s32 %v297_v61, %v295_v62 }
 0x50f   :  { %v299_v1 = vrot.slane %v298_v63, 4 }
 0x511   :  { %vm300_vm7 = vcmp.lt.s32.totalorder %v298_v63, %v299_v1 }
 0x512   :  { %v301_v33 = vsel %vm300_vm7, %v298_v63, %v299_v1 }
 0x513   :  { %v302_v3 = vrot.slane %v301_v33, 2 }
 0x515   :  { %vm303_vm8 = vcmp.lt.s32.totalorder %v301_v33, %v302_v3 }
 0x516   :  { %v304_v4 = vsel %vm303_vm8, %v301_v33, %v302_v3 }
 0x517   :  { %v305_v5 = vrot.slane %v304_v4, 1 }
 0x519   :  { %vm306_vm9 = vcmp.lt.s32.totalorder %v304_v4, %v305_v5 }
 0x51a   :  { %v307_v6 = vsel %vm306_vm9, %v304_v4, %v305_v5 }
 0x51b   :  { %1173 = vpush %v307_v6 }
 0x51c   :  { %1175 = vpush %v320_v7 }
 0x54c   :  { %s1174_s5 = spop %1173 }
 0x54d   :  { %s1176_s6 = spop %1175  ;;  %v311_v22 = vstv %s1174_s5 }
 0x54e   :  { %v322_v8 = vstv %s1176_s6  ;;  %s356_s7 = smul.f32 2.0, %s1176_s6  ;;  %v1508_v25 = vsel %vm1465_vm13, %v311_v22, %v1460_v12  ;;  %v1513_v26 = vsel %vm1470_vm14, %v311_v22, %v1462_v15 }
 0x54f   :  { %vm323_vm10 = vcmp.eq.f32.partialorder %v1488_v54, %v322_v8  ;;  %vm324_vm11 = vcmp.eq.f32.partialorder %v1493_v55, %v322_v8 }
 0x550   :  { %v325_v9 = vsel %vm323_vm10, %v1443_v48, 16  ;;  %v326_v10 = vsel %vm324_vm11, %v1446_v49, 16  ;;  %s1055_s8 = sadd.f32 -2.0, %s356_s7 }
 0x551   :  { %vm327_vm12 = vcmp.lt.s32.totalorder %v325_v9, %v326_v10 }
 0x552   :  { %v328_v11 = vsel %vm327_vm12, %v325_v9, %v326_v10  ;;  %v358_v23 = vstv %s1055_s8 }
 0x553   :  { %v329_v13 = vrot.slane %v328_v11, 4  ;;  %v359_v15 = vmul.f32 1.442695, %v358_v23 }
 0x555   :  { %vm330_vm15 = vcmp.lt.s32.totalorder %v328_v11, %v329_v13  ;;  %1260 = vpow2.f32 %v359_v15 }
 0x556   :  { %v331_v14 = vsel %vm330_vm15, %v328_v11, %v329_v13 }
 0x557   :  { %v332_v18 = vrot.slane %v331_v14, 2 }
 0x559   :  { %vm333_vm0 = vcmp.lt.s32.totalorder %v331_v14, %v332_v18 }
 0x55a   :  { %v334_v19 = vsel %vm333_vm0, %v331_v14, %v332_v18 }
 0x55b   :  { %v335_v20 = vrot.slane %v334_v19, 1 }
 0x55d   :  { %vm336_vm1 = vcmp.lt.s32.totalorder %v334_v19, %v335_v20 }
 0x55e   :  { %v337_v21 = vsel %vm336_vm1, %v334_v19, %v335_v20 }
 0x55f   :  { %1177 = vpush %v337_v21  ;;  %v1261_v38 = vpop.eup %1260 }
 0x590   :  { %s1501_s9 = spop %1177 }
 0x591   :  { %v339_v24 = vstv %s1501_s9  ;;  %365 = sst [smem:[#allocation3 + $0x1]] %s1501_s9  ;;  %s368_s12 = scalar_lea.vmem [#allocation2], %s1501_s9 }
 0x592   :  { %vm1516_vm2 = vcmp.eq.s32.totalorder %v1443_v48, %v339_v24  ;;  %vm1521_vm4 = vcmp.eq.s32.totalorder %v1446_v49, %v339_v24  ;;  %v369_v40 = vld [vmem:[%s368_s12] sm:$0x1] }
 0x593   :  { %v342_v12 = vsel %vm1516_vm2, %v1508_v25, 128  ;;  %v343_v16 = vsel %vm1521_vm4, %v1513_v26, 128 }
 0x594   :  { %vm344_vm13 = vcmp.lt.s32.totalorder %v342_v12, %v343_v16 }
 0x595   :  { %v345_v17 = vsel %vm344_vm13, %v342_v12, %v343_v16 }
 0x596   :  { %v346_v30 = vrot.slane %v345_v17, 4 }
 0x598   :  { %vm347_vm14 = vcmp.lt.s32.totalorder %v345_v17, %v346_v30 }
 0x599   :  { %v348_v31 = vsel %vm347_vm14, %v345_v17, %v346_v30 }
 0x59a   :  { %v349_v32 = vrot.slane %v348_v31, 2 }
 0x59c   :  { %vm350_vm5 = vcmp.lt.s32.totalorder %v348_v31, %v349_v32 }
 0x59d   :  { %v351_v34 = vsel %vm350_vm5, %v348_v31, %v349_v32 }
 0x59e   :  { %v352_v35 = vrot.slane %v351_v34, 1 }
 0x5a0   :  { %vm353_vm6 = vcmp.lt.s32.totalorder %v351_v34, %v352_v35 }
 0x5a1   :  { %v354_v37 = vsel %vm353_vm6, %v351_v34, %v352_v35 }
 0x5a2   :  { %1179 = vpush %v354_v37 }
 0x5a3   :  { %1181 = vpush %v1261_v38 }
 0x5d3   :  { %s1180_s10 = spop %1179 }
 0x5d4   :  { %367 = sst [smem:[#allocation5 + $0x1]] %s1180_s10  ;;  %v370_v39 = vstv %s1180_s10  ;;  %s1182_s11 = spop %1181 }
 0x5d5   :  { %vm371_vm7 = vcmp.eq.s32.totalorder %v1430_v28, %v370_v39  ;;  %363 = sst [smem:[#allocation7 + $0x1]] %s1182_s11 }
 0x5d6   :  { %v372_v41 = vsel %vm371_vm7, -inf, %v369_v40 }
 0x5d7   :  { %v374_v42 = vsel %vm270_vm3, %v372_v41, -inf  ;;  %373 = vst [vmem:[%s368_s12] sm:$0x1] %v372_v41 }
 0x5d8   :  { %375 = vmax.xlane.f32.xlu1 %v374_v42 }
 0x665   :  { %v376_v43 = vpop.xlane.xlu1 %375 }
 0x666   :  { %v377_v44 = vrot.slane %v376_v43, 4 }
 0x668   :  { %v378_v45 = vmax.f32 %v376_v43, %v377_v44 }
 0x66a   :  { %v379_v46 = vrot.slane %v378_v45, 2 }
 0x66c   :  { %v380_v47 = vmax.f32 %v378_v45, %v379_v46 }
 0x66e   :  { %v381_v50 = vrot.slane %v380_v47, 1 }
 0x670   :  { %v382_v51 = vmax.f32 %v380_v47, %v381_v50 }
 0x672   :  { %1183 = vpush %v382_v51 }
 0x6a3   :  { %s1184_s13 = spop %1183 }
 0x6a4   :  { %v384_v52 = vstv %s1184_s13 }
 0x6a5   :  { %vm385_vm8 = vcmp.eq.f32.partialorder %v372_v41, %v384_v52  ;;  %v1539_v63 = vsel %vm1516_vm2, %v384_v52, %v1488_v54  ;;  %v1544_v0 = vsel %vm1521_vm4, %v384_v52, %v1493_v55 }
 0x6a6   :  { %v386_v53 = vsel %vm385_vm8, %v1430_v28, 128  ;;  %v417_v1 = vmax.f32 %v1539_v63, %v1544_v0 }
 0x6a7   :  { %v387_v56 = vsel %vm270_vm3, %v386_v53, 2147483647 }
 0x6a8   :  { %v389_v57 = vshra.s32 %v387_v56, 16  ;;  %v388_v59 = vand.u32 65535, %v387_v56  ;;  %v418_v33 = vrot.slane %v417_v1, 4 }
 0x6aa   :  { %v391_v58 = vcvt.s32.f32 %v389_v57  ;;  %v390_v61 = vcvt.s32.f32 %v388_v59  ;;  %v419_v4 = vmax.f32 %v417_v1, %v418_v33 }
 0x6ac   :  { %392 = vmin.xlane.f32.xlu0 %v391_v58  ;;  %v420_v7 = vrot.slane %v419_v4, 2 }
 0x6ae   :  { %v421_v9 = vmax.f32 %v419_v4, %v420_v7 }
 0x6b0   :  { %v422_v55 = vrot.slane %v421_v9, 1 }
 0x6b2   :  { %v423_v18 = vmax.f32 %v421_v9, %v422_v55 }
 0x739   :  { %v393_v60 = vpop.xlane.xlu0 %392 }
 0x73a   :  { %vm394_vm9 = vcmp.eq.f32.partialorder %v391_v58, %v393_v60  ;;  %v399_v2 = vcvt.f32.s32 %v393_v60 }
 0x73b   :  { %v395_v62 = vsel %vm394_vm9, %v390_v61, inf }
 0x73c   :  { %396 = vmin.xlane.f32.xlu1 %v395_v62  ;;  %v400_v36 = vshll.u32 %v399_v2, 16 }
 0x7c9   :  { %v397_v3 = vpop.xlane.xlu1 %396 }
 0x7ca   :  { %v398_v5 = vcvt.f32.s32 %v397_v3 }
 0x7cc   :  { %v401_v6 = vadd.s32 %v400_v36, %v398_v5 }
 0x7ce   :  { %v402_v8 = vrot.slane %v401_v6, 4 }
 0x7d0   :  { %vm403_vm10 = vcmp.lt.s32.totalorder %v401_v6, %v402_v8 }
 0x7d1   :  { %v404_v54 = vsel %vm403_vm10, %v401_v6, %v402_v8 }
 0x7d2   :  { %v405_v10 = vrot.slane %v404_v54, 2 }
 0x7d4   :  { %vm406_vm11 = vcmp.lt.s32.totalorder %v404_v54, %v405_v10 }
 0x7d5   :  { %v407_v11 = vsel %vm406_vm11, %v404_v54, %v405_v10 }
 0x7d6   :  { %v408_v13 = vrot.slane %v407_v11, 1 }
 0x7d8   :  { %vm409_vm12 = vcmp.lt.s32.totalorder %v407_v11, %v408_v13 }
 0x7d9   :  { %v410_v14 = vsel %vm409_vm12, %v407_v11, %v408_v13 }
 0x7da   :  { %1185 = vpush %v410_v14 }
 0x7db   :  { %1187 = vpush %v423_v18 }
 0x80b   :  { %s1186_s14 = spop %1185 }
 0x80c   :  { %s1188_s15 = spop %1187  ;;  %v414_v30 = vstv %s1186_s14 }
 0x80d   :  { %v425_v19 = vstv %s1188_s15  ;;  %s459_s16 = smul.f32 2.0, %s1188_s15  ;;  %v1559_v34 = vsel %vm1516_vm2, %v414_v30, %v1508_v25  ;;  %v1564_v35 = vsel %vm1521_vm4, %v414_v30, %v1513_v26 }
 0x80e   :  { %vm426_vm15 = vcmp.eq.f32.partialorder %v1539_v63, %v425_v19  ;;  %vm427_vm0 = vcmp.eq.f32.partialorder %v1544_v0, %v425_v19 }
 0x80f   :  { %v428_v20 = vsel %vm426_vm15, %v1443_v48, 16  ;;  %v429_v21 = vsel %vm427_vm0, %v1446_v49, 16  ;;  %s1056_s17 = sadd.f32 -2.0, %s459_s16 }
 0x810   :  { %vm430_vm1 = vcmp.lt.s32.totalorder %v428_v20, %v429_v21 }
 0x811   :  { %v431_v22 = vsel %vm430_vm1, %v428_v20, %v429_v21  ;;  %v461_v31 = vstv %s1056_s17 }
 0x812   :  { %v432_v23 = vrot.slane %v431_v22, 4  ;;  %v462_v26 = vmul.f32 1.442695, %v461_v31 }
 0x814   :  { %vm433_vm13 = vcmp.lt.s32.totalorder %v431_v22, %v432_v23  ;;  %1262 = vpow2.f32 %v462_v26 }
 0x815   :  { %v434_v24 = vsel %vm433_vm13, %v431_v22, %v432_v23 }
 0x816   :  { %v435_v12 = vrot.slane %v434_v24, 2 }
 0x818   :  { %vm436_vm14 = vcmp.lt.s32.totalorder %v434_v24, %v435_v12 }
 0x819   :  { %v437_v16 = vsel %vm436_vm14, %v434_v24, %v435_v12 }
 0x81a   :  { %v438_v15 = vrot.slane %v437_v16, 1 }
 0x81c   :  { %vm439_vm5 = vcmp.lt.s32.totalorder %v437_v16, %v438_v15 }
 0x81d   :  { %v440_v17 = vsel %vm439_vm5, %v437_v16, %v438_v15 }
 0x81e   :  { %1189 = vpush %v440_v17  ;;  %v1263_v45 = vpop.eup %1262 }
 0x84f   :  { %s1552_s18 = spop %1189 }
 0x850   :  { %v442_v32 = vstv %s1552_s18  ;;  %468 = sst [smem:[#allocation3 + $0x2]] %s1552_s18  ;;  %s471_s21 = scalar_lea.vmem [#allocation2], %s1552_s18 }
 0x851   :  { %vm1567_vm6 = vcmp.eq.s32.totalorder %v1443_v48, %v442_v32  ;;  %vm1572_vm7 = vcmp.eq.s32.totalorder %v1446_v49, %v442_v32  ;;  %v472_v47 = vld [vmem:[%s471_s21] sm:$0x1] }
 0x852   :  { %v445_v25 = vsel %vm1567_vm6, %v1559_v34, 128  ;;  %v446_v27 = vsel %vm1572_vm7, %v1564_v35, 128 }
 0x853   :  { %vm447_vm2 = vcmp.lt.s32.totalorder %v445_v25, %v446_v27 }
 0x854   :  { %v448_v29 = vsel %vm447_vm2, %v445_v25, %v446_v27 }
 0x855   :  { %v449_v39 = vrot.slane %v448_v29, 4 }
 0x857   :  { %vm450_vm4 = vcmp.lt.s32.totalorder %v448_v29, %v449_v39 }
 0x858   :  { %v451_v40 = vsel %vm450_vm4, %v448_v29, %v449_v39 }
 0x859   :  { %v452_v41 = vrot.slane %v451_v40, 2 }
 0x85b   :  { %vm453_vm8 = vcmp.lt.s32.totalorder %v451_v40, %v452_v41 }
 0x85c   :  { %v454_v42 = vsel %vm453_vm8, %v451_v40, %v452_v41 }
 0x85d   :  { %v455_v43 = vrot.slane %v454_v42, 1 }
 0x85f   :  { %vm456_vm9 = vcmp.lt.s32.totalorder %v454_v42, %v455_v43 }
 0x860   :  { %v457_v44 = vsel %vm456_vm9, %v454_v42, %v455_v43 }
 0x861   :  { %1191 = vpush %v457_v44 }
 0x862   :  { %1193 = vpush %v1263_v45 }
 0x892   :  { %s1192_s19 = spop %1191 }
 0x893   :  { %470 = sst [smem:[#allocation5 + $0x2]] %s1192_s19  ;;  %v473_v46 = vstv %s1192_s19  ;;  %s1194_s20 = spop %1193 }
 0x894   :  { %vm474_vm10 = vcmp.eq.s32.totalorder %v1430_v28, %v473_v46  ;;  %466 = sst [smem:[#allocation7 + $0x2]] %s1194_s20 }
 0x895   :  { %v475_v50 = vsel %vm474_vm10, -inf, %v472_v47 }
 0x896   :  { %v477_v51 = vsel %vm270_vm3, %v475_v50, -inf  ;;  %476 = vst [vmem:[%s471_s21] sm:$0x1] %v475_v50 }
 0x897   :  { %478 = vmax.xlane.f32.xlu0 %v477_v51 }
 0x924   :  { %v479_v52 = vpop.xlane.xlu0 %478 }
 0x925   :  { %v480_v53 = vrot.slane %v479_v52, 4 }
 0x927   :  { %v481_v56 = vmax.f32 %v479_v52, %v480_v53 }
 0x929   :  { %v482_v57 = vrot.slane %v481_v56, 2 }
 0x92b   :  { %v483_v58 = vmax.f32 %v481_v56, %v482_v57 }
 0x92d   :  { %v484_v59 = vrot.slane %v483_v58, 1 }
 0x92f   :  { %v485_v60 = vmax.f32 %v483_v58, %v484_v59 }
 0x931   :  { %1195 = vpush %v485_v60 }
 0x962   :  { %s1196_s22 = spop %1195 }
 0x963   :  { %v487_v61 = vstv %s1196_s22 }
 0x964   :  { %vm488_vm11 = vcmp.eq.f32.partialorder %v475_v50, %v487_v61  ;;  %v1590_v6 = vsel %vm1567_vm6, %v487_v61, %v1539_v63  ;;  %v1595_v7 = vsel %vm1572_vm7, %v487_v61, %v1544_v0 }
 0x965   :  { %v489_v62 = vsel %vm488_vm11, %v1430_v28, 128  ;;  %v520_v8 = vmax.f32 %v1590_v6, %v1595_v7 }
 0x966   :  { %v490_v1 = vsel %vm270_vm3, %v489_v62, 2147483647 }
 0x967   :  { %v492_v33 = vshra.s32 %v490_v1, 16  ;;  %v491_v3 = vand.u32 65535, %v490_v1  ;;  %v521_v54 = vrot.slane %v520_v8, 4 }
 0x969   :  { %v494_v2 = vcvt.s32.f32 %v492_v33  ;;  %v493_v36 = vcvt.s32.f32 %v491_v3  ;;  %v522_v11 = vmax.f32 %v520_v8, %v521_v54 }
 0x96b   :  { %495 = vmin.xlane.f32.xlu1 %v494_v2  ;;  %v523_v18 = vrot.slane %v522_v11, 2 }
 0x96d   :  { %v524_v20 = vmax.f32 %v522_v11, %v523_v18 }
 0x96f   :  { %v525_v0 = vrot.slane %v524_v20, 1 }
 0x971   :  { %v526_v12 = vmax.f32 %v524_v20, %v525_v0 }
 0x9f8   :  { %v496_v4 = vpop.xlane.xlu1 %495 }
 0x9f9   :  { %vm497_vm12 = vcmp.eq.f32.partialorder %v494_v2, %v496_v4  ;;  %v502_v9 = vcvt.f32.s32 %v496_v4 }
 0x9fa   :  { %v498_v5 = vsel %vm497_vm12, %v493_v36, inf }
 0x9fb   :  { %499 = vmin.xlane.f32.xlu0 %v498_v5  ;;  %v503_v55 = vshll.u32 %v502_v9, 16 }
 0xa88   :  { %v500_v10 = vpop.xlane.xlu0 %499 }
 0xa89   :  { %v501_v13 = vcvt.f32.s32 %v500_v10 }
 0xa8b   :  { %v504_v14 = vadd.s32 %v503_v55, %v501_v13 }
 0xa8d   :  { %v505_v19 = vrot.slane %v504_v14, 4 }
 0xa8f   :  { %vm506_vm15 = vcmp.lt.s32.totalorder %v504_v14, %v505_v19 }
 0xa90   :  { %v507_v63 = vsel %vm506_vm15, %v504_v14, %v505_v19 }
 0xa91   :  { %v508_v21 = vrot.slane %v507_v63, 2 }
 0xa93   :  { %vm509_vm0 = vcmp.lt.s32.totalorder %v507_v63, %v508_v21 }
 0xa94   :  { %v510_v22 = vsel %vm509_vm0, %v507_v63, %v508_v21 }
 0xa95   :  { %v511_v23 = vrot.slane %v510_v22, 1 }
 0xa97   :  { %vm512_vm1 = vcmp.lt.s32.totalorder %v510_v22, %v511_v23 }
 0xa98   :  { %v513_v24 = vsel %vm512_vm1, %v510_v22, %v511_v23 }
 0xa99   :  { %1197 = vpush %v513_v24 }
 0xa9a   :  { %1199 = vpush %v526_v12 }
 0xaca   :  { %s1198_s23 = spop %1197 }
 0xacb   :  { %s1200_s24 = spop %1199  ;;  %v517_v39 = vstv %s1198_s23 }
 0xacc   :  { %v528_v16 = vstv %s1200_s24  ;;  %s562_s0 = smul.f32 2.0, %s1200_s24  ;;  %v1610_v42 = vsel %vm1567_vm6, %v517_v39, %v1559_v34  ;;  %v1615_v43 = vsel %vm1572_vm7, %v517_v39, %v1564_v35 }
 0xacd   :  { %vm529_vm13 = vcmp.eq.f32.partialorder %v1590_v6, %v528_v16  ;;  %vm530_vm14 = vcmp.eq.f32.partialorder %v1595_v7, %v528_v16 }
 0xace   :  { %v531_v15 = vsel %vm529_vm13, %v1443_v48, 16  ;;  %v532_v17 = vsel %vm530_vm14, %v1446_v49, 16  ;;  %s1057_s1 = sadd.f32 -2.0, %s562_s0 }
 0xacf   :  { %vm533_vm5 = vcmp.lt.s32.totalorder %v531_v15, %v532_v17 }
 0xad0   :  { %v534_v30 = vsel %vm533_vm5, %v531_v15, %v532_v17  ;;  %v564_v40 = vstv %s1057_s1 }
 0xad1   :  { %v535_v31 = vrot.slane %v534_v30, 4  ;;  %v565_v35 = vmul.f32 1.442695, %v564_v40 }
 0xad3   :  { %vm536_vm2 = vcmp.lt.s32.totalorder %v534_v30, %v535_v31  ;;  %1264 = vpow2.f32 %v565_v35 }
 0xad4   :  { %v537_v32 = vsel %vm536_vm2, %v534_v30, %v535_v31 }
 0xad5   :  { %v538_v25 = vrot.slane %v537_v32, 2 }
 0xad7   :  { %vm539_vm4 = vcmp.lt.s32.totalorder %v537_v32, %v538_v25 }
 0xad8   :  { %v540_v27 = vsel %vm539_vm4, %v537_v32, %v538_v25 }
 0xad9   :  { %v541_v26 = vrot.slane %v540_v27, 1 }
 0xadb   :  { %vm542_vm8 = vcmp.lt.s32.totalorder %v540_v27, %v541_v26 }
 0xadc   :  { %v543_v29 = vsel %vm542_vm8, %v540_v27, %v541_v26 }
 0xadd   :  { %1201 = vpush %v543_v29  ;;  %v1265_v56 = vpop.eup %1264 }
 0xb0e   :  { %s1603_s25 = spop %1201 }
 0xb0f   :  { %v545_v41 = vstv %s1603_s25  ;;  %571 = sst [smem:[#allocation3 + $0x3]] %s1603_s25  ;;  %s574_s28 = scalar_lea.vmem [#allocation2], %s1603_s25 }
 0xb10   :  { %vm1618_vm9 = vcmp.eq.s32.totalorder %v1443_v48, %v545_v41  ;;  %vm1623_vm10 = vcmp.eq.s32.totalorder %v1446_v49, %v545_v41  ;;  %v575_v58 = vld [vmem:[%s574_s28] sm:$0x1] }
 0xb11   :  { %v548_v34 = vsel %vm1618_vm9, %v1610_v42, 128  ;;  %v549_v37 = vsel %vm1623_vm10, %v1615_v43, 128 }
 0xb12   :  { %vm550_vm6 = vcmp.lt.s32.totalorder %v548_v34, %v549_v37 }
 0xb13   :  { %v551_v38 = vsel %vm550_vm6, %v548_v34, %v549_v37 }
 0xb14   :  { %v552_v46 = vrot.slane %v551_v38, 4 }
 0xb16   :  { %vm553_vm7 = vcmp.lt.s32.totalorder %v551_v38, %v552_v46 }
 0xb17   :  { %v554_v47 = vsel %vm553_vm7, %v551_v38, %v552_v46 }
 0xb18   :  { %v555_v50 = vrot.slane %v554_v47, 2 }
 0xb1a   :  { %vm556_vm11 = vcmp.lt.s32.totalorder %v554_v47, %v555_v50 }
 0xb1b   :  { %v557_v51 = vsel %vm556_vm11, %v554_v47, %v555_v50 }
 0xb1c   :  { %v558_v52 = vrot.slane %v557_v51, 1 }
 0xb1e   :  { %vm559_vm12 = vcmp.lt.s32.totalorder %v557_v51, %v558_v52 }
 0xb1f   :  { %v560_v53 = vsel %vm559_vm12, %v557_v51, %v558_v52 }
 0xb20   :  { %1203 = vpush %v560_v53 }
 0xb21   :  { %1205 = vpush %v1265_v56 }
 0xb51   :  { %s1204_s26 = spop %1203 }
 0xb52   :  { %573 = sst [smem:[#allocation5 + $0x3]] %s1204_s26  ;;  %v576_v57 = vstv %s1204_s26  ;;  %s1206_s27 = spop %1205 }
 0xb53   :  { %vm577_vm15 = vcmp.eq.s32.totalorder %v1430_v28, %v576_v57  ;;  %569 = sst [smem:[#allocation7 + $0x3]] %s1206_s27 }
 0xb54   :  { %v578_v59 = vsel %vm577_vm15, -inf, %v575_v58 }
 0xb55   :  { %v580_v60 = vsel %vm270_vm3, %v578_v59, -inf  ;;  %579 = vst [vmem:[%s574_s28] sm:$0x1] %v578_v59 }
 0xb56   :  { %581 = vmax.xlane.f32.xlu1 %v580_v60 }
 0xbe3   :  { %v582_v61 = vpop.xlane.xlu1 %581 }
 0xbe4   :  { %v583_v62 = vrot.slane %v582_v61, 4 }
 0xbe6   :  { %v584_v1 = vmax.f32 %v582_v61, %v583_v62 }
 0xbe8   :  { %v585_v33 = vrot.slane %v584_v1, 2 }
 0xbea   :  { %v586_v2 = vmax.f32 %v584_v1, %v585_v33 }
 0xbec   :  { %v587_v3 = vrot.slane %v586_v2, 1 }
 0xbee   :  { %v588_v4 = vmax.f32 %v586_v2, %v587_v3 }
 0xbf0   :  { %1207 = vpush %v588_v4 }
 0xc21   :  { %s1208_s29 = spop %1207 }
 0xc22   :  { %v590_v36 = vstv %s1208_s29 }
 0xc23   :  { %vm591_vm0 = vcmp.eq.f32.partialorder %v578_v59, %v590_v36  ;;  %v1641_v14 = vsel %vm1618_vm9, %v590_v36, %v1590_v6  ;;  %v1646_v18 = vsel %vm1623_vm10, %v590_v36, %v1595_v7 }
 0xc24   :  { %v592_v5 = vsel %vm591_vm0, %v1430_v28, 128  ;;  %v623_v19 = vmax.f32 %v1641_v14, %v1646_v18 }
 0xc25   :  { %v593_v8 = vsel %vm270_vm3, %v592_v5, 2147483647 }
 0xc26   :  { %v595_v54 = vshra.s32 %v593_v8, 16  ;;  %v594_v10 = vand.u32 65535, %v593_v8  ;;  %v624_v63 = vrot.slane %v623_v19, 4 }
 0xc28   :  { %v597_v9 = vcvt.s32.f32 %v595_v54  ;;  %v596_v55 = vcvt.s32.f32 %v594_v10  ;;  %v625_v22 = vmax.f32 %v623_v19, %v624_v63 }
 0xc2a   :  { %598 = vmin.xlane.f32.xlu0 %v597_v9  ;;  %v626_v12 = vrot.slane %v625_v22, 2 }
 0xc2c   :  { %v627_v15 = vmax.f32 %v625_v22, %v626_v12 }
 0xc2e   :  { %v628_v7 = vrot.slane %v627_v15, 1 }
 0xc30   :  { %v629_v25 = vmax.f32 %v627_v15, %v628_v7 }
 0xcb7   :  { %v599_v11 = vpop.xlane.xlu0 %598 }
 0xcb8   :  { %vm600_vm1 = vcmp.eq.f32.partialorder %v597_v9, %v599_v11  ;;  %v605_v20 = vcvt.f32.s32 %v599_v11 }
 0xcb9   :  { %v601_v13 = vsel %vm600_vm1, %v596_v55, inf }
 0xcba   :  { %602 = vmin.xlane.f32.xlu1 %v601_v13  ;;  %v606_v0 = vshll.u32 %v605_v20, 16 }
 0xd47   :  { %v603_v21 = vpop.xlane.xlu1 %602 }
 0xd48   :  { %v604_v23 = vcvt.f32.s32 %v603_v21 }
 0xd4a   :  { %v607_v24 = vadd.s32 %v606_v0, %v604_v23 }
 0xd4c   :  { %v608_v16 = vrot.slane %v607_v24, 4 }
 0xd4e   :  { %vm609_vm13 = vcmp.lt.s32.totalorder %v607_v24, %v608_v16 }
 0xd4f   :  { %v610_v6 = vsel %vm609_vm13, %v607_v24, %v608_v16 }
 0xd50   :  { %v611_v17 = vrot.slane %v610_v6, 2 }
 0xd52   :  { %vm612_vm14 = vcmp.lt.s32.totalorder %v610_v6, %v611_v17 }
 0xd53   :  { %v613_v30 = vsel %vm612_vm14, %v610_v6, %v611_v17 }
 0xd54   :  { %v614_v31 = vrot.slane %v613_v30, 1 }
 0xd56   :  { %vm615_vm5 = vcmp.lt.s32.totalorder %v613_v30, %v614_v31 }
 0xd57   :  { %v616_v32 = vsel %vm615_vm5, %v613_v30, %v614_v31 }
 0xd58   :  { %1209 = vpush %v616_v32 }
 0xd59   :  { %1211 = vpush %v629_v25 }
 0xd89   :  { %s1210_s30 = spop %1209 }
 0xd8a   :  { %s1212_s5 = spop %1211  ;;  %v620_v46 = vstv %s1210_s30 }
 0xd8b   :  { %v631_v27 = vstv %s1212_s5  ;;  %s665_s6 = smul.f32 2.0, %s1212_s5  ;;  %v1661_v51 = vsel %vm1618_vm9, %v620_v46, %v1610_v42  ;;  %v1666_v52 = vsel %vm1623_vm10, %v620_v46, %v1615_v43 }
 0xd8c   :  { %vm632_vm2 = vcmp.eq.f32.partialorder %v1641_v14, %v631_v27  ;;  %vm633_vm4 = vcmp.eq.f32.partialorder %v1646_v18, %v631_v27 }
 0xd8d   :  { %v634_v26 = vsel %vm632_vm2, %v1443_v48, 16  ;;  %v635_v29 = vsel %vm633_vm4, %v1446_v49, 16  ;;  %s1058_s7 = sadd.f32 -2.0, %s665_s6 }
 0xd8e   :  { %vm636_vm8 = vcmp.lt.s32.totalorder %v634_v26, %v635_v29 }
 0xd8f   :  { %v637_v39 = vsel %vm636_vm8, %v634_v26, %v635_v29  ;;  %v667_v47 = vstv %s1058_s7 }
 0xd90   :  { %v638_v40 = vrot.slane %v637_v39, 4  ;;  %v668_v43 = vmul.f32 1.442695, %v667_v47 }
 0xd92   :  { %vm639_vm6 = vcmp.lt.s32.totalorder %v637_v39, %v638_v40  ;;  %1266 = vpow2.f32 %v668_v43 }
 0xd93   :  { %v640_v41 = vsel %vm639_vm6, %v637_v39, %v638_v40 }
 0xd94   :  { %v641_v34 = vrot.slane %v640_v41, 2 }
 0xd96   :  { %vm642_vm7 = vcmp.lt.s32.totalorder %v640_v41, %v641_v34 }
 0xd97   :  { %v643_v37 = vsel %vm642_vm7, %v640_v41, %v641_v34 }
 0xd98   :  { %v644_v35 = vrot.slane %v643_v37, 1 }
 0xd9a   :  { %vm645_vm11 = vcmp.lt.s32.totalorder %v643_v37, %v644_v35 }
 0xd9b   :  { %v646_v38 = vsel %vm645_vm11, %v643_v37, %v644_v35 }
 0xd9c   :  { %1213 = vpush %v646_v38  ;;  %v1267_v1 = vpop.eup %1266 }
 0xdcd   :  { %s1654_s8 = spop %1213 }
 0xdce   :  { %v648_v50 = vstv %s1654_s8  ;;  %674 = sst [smem:[#allocation3 + $0x4]] %s1654_s8  ;;  %s677_s11 = scalar_lea.vmem [#allocation2], %s1654_s8 }
 0xdcf   :  { %vm1669_vm12 = vcmp.eq.s32.totalorder %v1443_v48, %v648_v50  ;;  %vm1674_vm15 = vcmp.eq.s32.totalorder %v1446_v49, %v648_v50  ;;  %v678_v2 = vld [vmem:[%s677_s11] sm:$0x1] }
 0xdd0   :  { %v651_v42 = vsel %vm1669_vm12, %v1661_v51, 128  ;;  %v652_v44 = vsel %vm1674_vm15, %v1666_v52, 128 }
 0xdd1   :  { %vm653_vm9 = vcmp.lt.s32.totalorder %v651_v42, %v652_v44 }
 0xdd2   :  { %v654_v45 = vsel %vm653_vm9, %v651_v42, %v652_v44 }
 0xdd3   :  { %v655_v57 = vrot.slane %v654_v45, 4 }
 0xdd5   :  { %vm656_vm10 = vcmp.lt.s32.totalorder %v654_v45, %v655_v57 }
 0xdd6   :  { %v657_v58 = vsel %vm656_vm10, %v654_v45, %v655_v57 }
 0xdd7   :  { %v658_v59 = vrot.slane %v657_v58, 2 }
 0xdd9   :  { %vm659_vm0 = vcmp.lt.s32.totalorder %v657_v58, %v658_v59 }
 0xdda   :  { %v660_v60 = vsel %vm659_vm0, %v657_v58, %v658_v59 }
 0xddb   :  { %v661_v61 = vrot.slane %v660_v60, 1 }
 0xddd   :  { %vm662_vm1 = vcmp.lt.s32.totalorder %v660_v60, %v661_v61 }
 0xdde   :  { %v663_v62 = vsel %vm662_vm1, %v660_v60, %v661_v61 }
 0xddf   :  { %1215 = vpush %v663_v62 }
 0xde0   :  { %1217 = vpush %v1267_v1 }
 0xe10   :  { %s1216_s9 = spop %1215 }
 0xe11   :  { %676 = sst [smem:[#allocation5 + $0x4]] %s1216_s9  ;;  %v679_v33 = vstv %s1216_s9  ;;  %s1218_s10 = spop %1217 }
 0xe12   :  { %vm680_vm13 = vcmp.eq.s32.totalorder %v1430_v28, %v679_v33  ;;  %672 = sst [smem:[#allocation7 + $0x4]] %s1218_s10  ;;  %s1274_s10 = scalar_lea.hbm %s1851_s2, 16 }
 0xe13   :  { %v681_v3 = vsel %vm680_vm13, -inf, %v678_v2  ;;  %p1275_p0 = scmp.ne.s32.totalorder %s1851_s2, %s1274_s10  ;;  %p1278_p1 = scmp.lt.u32.totalorder %s1274_s10, %s1851_s2 }
 0xe14   :  { %v683_v4 = vsel %vm270_vm3, %v681_v3, -inf  ;;  %682 = vst [vmem:[%s677_s11] sm:$0x1] %v681_v3 }
 0xe15   :  { %684 = vmax.xlane.f32.xlu0 %v683_v4  ;;  %p1280_p2 = pnand %p1278_p1, %p1275_p0 }
 0xea2   :  { %v685_v36 = vpop.xlane.xlu0 %684 }
 0xea3   :  { %v686_v5 = vrot.slane %v685_v36, 4 }
 0xea5   :  { %v687_v8 = vmax.f32 %v685_v36, %v686_v5 }
 0xea7   :  { %v688_v54 = vrot.slane %v687_v8, 2 }
 0xea9   :  { %v689_v9 = vmax.f32 %v687_v8, %v688_v54 }
 0xeab   :  { %v690_v10 = vrot.slane %v689_v9, 1 }
 0xead   :  { %v691_v11 = vmax.f32 %v689_v9, %v690_v10 }
 0xeaf   :  { %1219 = vpush %v691_v11 }
 0xee0   :  { %s1220_s12 = spop %1219 }
 0xee1   :  { %v693_v55 = vstv %s1220_s12 }
 0xee2   :  { %vm694_vm14 = vcmp.eq.f32.partialorder %v681_v3, %v693_v55  ;;  %v1692_v24 = vsel %vm1669_vm12, %v693_v55, %v1641_v14  ;;  %v1697_v12 = vsel %vm1674_vm15, %v693_v55, %v1646_v18 }
 0xee3   :  { %v695_v13 = vsel %vm694_vm14, %v1430_v28, 128  ;;  %v726_v16 = vmax.f32 %v1692_v24, %v1697_v12 }
 0xee4   :  { %v696_v19 = vsel %vm270_vm3, %v695_v13, 2147483647 }
 0xee5   :  { %v698_v63 = vshra.s32 %v696_v19, 16  ;;  %v697_v21 = vand.u32 65535, %v696_v19  ;;  %v727_v6 = vrot.slane %v726_v16, 4 }
 0xee7   :  { %v700_v20 = vcvt.s32.f32 %v698_v63  ;;  %v699_v0 = vcvt.s32.f32 %v697_v21  ;;  %v728_v30 = vmax.f32 %v726_v16, %v727_v6 }
 0xee9   :  { %701 = vmin.xlane.f32.xlu1 %v700_v20  ;;  %v729_v25 = vrot.slane %v728_v30, 2 }
 0xeeb   :  { %v730_v26 = vmax.f32 %v728_v30, %v729_v25 }
 0xeed   :  { %v731_v18 = vrot.slane %v730_v26, 1 }
 0xeef   :  { %v732_v34 = vmax.f32 %v730_v26, %v731_v18 }
 0xf76   :  { %v702_v22 = vpop.xlane.xlu1 %701 }
 0xf77   :  { %vm703_vm5 = vcmp.eq.f32.partialorder %v700_v20, %v702_v22  ;;  %v708_v15 = vcvt.f32.s32 %v702_v22 }
 0xf78   :  { %v704_v23 = vsel %vm703_vm5, %v699_v0, inf }
 0xf79   :  { %705 = vmin.xlane.f32.xlu0 %v704_v23  ;;  %v709_v7 = vshll.u32 %v708_v15, 16 }
0x1006   :  { %v706_v17 = vpop.xlane.xlu0 %705 }
0x1007   :  { %v707_v31 = vcvt.f32.s32 %v706_v17 }
0x1009   :  { %v710_v32 = vadd.s32 %v709_v7, %v707_v31 }
0x100b   :  { %v711_v27 = vrot.slane %v710_v32, 4 }
0x100d   :  { %vm712_vm2 = vcmp.lt.s32.totalorder %v710_v32, %v711_v27 }
0x100e   :  { %v713_v14 = vsel %vm712_vm2, %v710_v32, %v711_v27 }
0x100f   :  { %v714_v29 = vrot.slane %v713_v14, 2 }
0x1011   :  { %vm715_vm4 = vcmp.lt.s32.totalorder %v713_v14, %v714_v29 }
0x1012   :  { %v716_v39 = vsel %vm715_vm4, %v713_v14, %v714_v29 }
0x1013   :  { %v717_v40 = vrot.slane %v716_v39, 1 }
0x1015   :  { %vm718_vm8 = vcmp.lt.s32.totalorder %v716_v39, %v717_v40 }
0x1016   :  { %v719_v41 = vsel %vm718_vm8, %v716_v39, %v717_v40 }
0x1017   :  { %1221 = vpush %v719_v41 }
0x1018   :  { %1223 = vpush %v732_v34 }
0x1048   :  { %s1222_s13 = spop %1221 }
0x1049   :  { %s1224_s14 = spop %1223  ;;  %v723_v57 = vstv %s1222_s13 }
0x104a   :  { %v734_v37 = vstv %s1224_s14  ;;  %s768_s15 = smul.f32 2.0, %s1224_s14  ;;  %v1712_v60 = vsel %vm1669_vm12, %v723_v57, %v1661_v51  ;;  %v1717_v61 = vsel %vm1674_vm15, %v723_v57, %v1666_v52 }
0x104b   :  { %vm735_vm6 = vcmp.eq.f32.partialorder %v1692_v24, %v734_v37  ;;  %vm736_vm7 = vcmp.eq.f32.partialorder %v1697_v12, %v734_v37 }
0x104c   :  { %v737_v35 = vsel %vm735_vm6, %v1443_v48, 16  ;;  %v738_v38 = vsel %vm736_vm7, %v1446_v49, 16  ;;  %s1059_s16 = sadd.f32 -2.0, %s768_s15 }
0x104d   :  { %vm739_vm11 = vcmp.lt.s32.totalorder %v737_v35, %v738_v38 }
0x104e   :  { %v740_v46 = vsel %vm739_vm11, %v737_v35, %v738_v38  ;;  %v770_v58 = vstv %s1059_s16 }
0x104f   :  { %v741_v47 = vrot.slane %v740_v46, 4  ;;  %v771_v52 = vmul.f32 1.442695, %v770_v58 }
0x1051   :  { %vm742_vm9 = vcmp.lt.s32.totalorder %v740_v46, %v741_v47  ;;  %1268 = vpow2.f32 %v771_v52 }
0x1052   :  { %v743_v50 = vsel %vm742_vm9, %v740_v46, %v741_v47 }
0x1053   :  { %v744_v42 = vrot.slane %v743_v50, 2 }
0x1055   :  { %vm745_vm10 = vcmp.lt.s32.totalorder %v743_v50, %v744_v42 }
0x1056   :  { %v746_v44 = vsel %vm745_vm10, %v743_v50, %v744_v42 }
0x1057   :  { %v747_v43 = vrot.slane %v746_v44, 1 }
0x1059   :  { %vm748_vm0 = vcmp.lt.s32.totalorder %v746_v44, %v747_v43 }
0x105a   :  { %v749_v45 = vsel %vm748_vm0, %v746_v44, %v747_v43 }
0x105b   :  { %1225 = vpush %v749_v45  ;;  %v1269_v8 = vpop.eup %1268 }
0x108c   :  { %s1705_s17 = spop %1225 }
0x108d   :  { %v751_v59 = vstv %s1705_s17  ;;  %777 = sst [smem:[#allocation3 + $0x5]] %s1705_s17  ;;  %s780_s20 = scalar_lea.vmem [#allocation2], %s1705_s17 }
0x108e   :  { %vm1720_vm1 = vcmp.eq.s32.totalorder %v1443_v48, %v751_v59  ;;  %vm1725_vm13 = vcmp.eq.s32.totalorder %v1446_v49, %v751_v59  ;;  %v781_v9 = vld [vmem:[%s780_s20] sm:$0x1] }
0x108f   :  { %v754_v51 = vsel %vm1720_vm1, %v1712_v60, 128  ;;  %v755_v53 = vsel %vm1725_vm13, %v1717_v61, 128 }
0x1090   :  { %vm756_vm12 = vcmp.lt.s32.totalorder %v754_v51, %v755_v53 }
0x1091   :  { %v757_v56 = vsel %vm756_vm12, %v754_v51, %v755_v53 }
0x1092   :  { %v758_v33 = vrot.slane %v757_v56, 4 }
0x1094   :  { %vm759_vm15 = vcmp.lt.s32.totalorder %v757_v56, %v758_v33 }
0x1095   :  { %v760_v2 = vsel %vm759_vm15, %v757_v56, %v758_v33 }
0x1096   :  { %v761_v3 = vrot.slane %v760_v2, 2 }
0x1098   :  { %vm762_vm14 = vcmp.lt.s32.totalorder %v760_v2, %v761_v3 }
0x1099   :  { %v763_v4 = vsel %vm762_vm14, %v760_v2, %v761_v3 }
0x109a   :  { %v764_v36 = vrot.slane %v763_v4, 1 }
0x109c   :  { %vm765_vm5 = vcmp.lt.s32.totalorder %v763_v4, %v764_v36 }
0x109d   :  { %v766_v5 = vsel %vm765_vm5, %v763_v4, %v764_v36 }
0x109e   :  { %1227 = vpush %v766_v5 }
0x109f   :  { %1229 = vpush %v1269_v8 }
0x10cf   :  { %s1228_s18 = spop %1227 }
0x10d0   :  { %779 = sst [smem:[#allocation5 + $0x5]] %s1228_s18  ;;  %v782_v54 = vstv %s1228_s18  ;;  %s1230_s19 = spop %1229 }
0x10d1   :  { %vm783_vm2 = vcmp.eq.s32.totalorder %v1430_v28, %v782_v54  ;;  %775 = sst [smem:[#allocation7 + $0x5]] %s1230_s19 }
0x10d2   :  { %v784_v10 = vsel %vm783_vm2, -inf, %v781_v9 }
0x10d3   :  { %v786_v11 = vsel %vm270_vm3, %v784_v10, -inf  ;;  %785 = vst [vmem:[%s780_s20] sm:$0x1] %v784_v10 }
0x10d4   :  { %787 = vmax.xlane.f32.xlu1 %v786_v11 }
0x1161   :  { %v788_v55 = vpop.xlane.xlu1 %787 }
0x1162   :  { %v789_v13 = vrot.slane %v788_v55, 4 }
0x1164   :  { %v790_v19 = vmax.f32 %v788_v55, %v789_v13 }
0x1166   :  { %v791_v63 = vrot.slane %v790_v19, 2 }
0x1168   :  { %v792_v20 = vmax.f32 %v790_v19, %v791_v63 }
0x116a   :  { %v793_v21 = vrot.slane %v792_v20, 1 }
0x116c   :  { %v794_v22 = vmax.f32 %v792_v20, %v793_v21 }
0x116e   :  { %1231 = vpush %v794_v22 }
0x119f   :  { %s1232_s21 = spop %1231 }
0x11a0   :  { %v796_v0 = vstv %s1232_s21 }
0x11a1   :  { %vm797_vm4 = vcmp.eq.f32.partialorder %v784_v10, %v796_v0  ;;  %v1743_v32 = vsel %vm1720_vm1, %v796_v0, %v1692_v24  ;;  %v1748_v25 = vsel %vm1725_vm13, %v796_v0, %v1697_v12 }
0x11a2   :  { %v798_v23 = vsel %vm797_vm4, %v1430_v28, 128  ;;  %v829_v27 = vmax.f32 %v1743_v32, %v1748_v25 }
0x11a3   :  { %v799_v16 = vsel %vm270_vm3, %v798_v23, 2147483647 }
0x11a4   :  { %v801_v6 = vshra.s32 %v799_v16, 16  ;;  %v800_v17 = vand.u32 65535, %v799_v16  ;;  %v830_v14 = vrot.slane %v829_v27, 4 }
0x11a6   :  { %v803_v15 = vcvt.s32.f32 %v801_v6  ;;  %v802_v7 = vcvt.s32.f32 %v800_v17  ;;  %v831_v39 = vmax.f32 %v829_v27, %v830_v14 }
0x11a8   :  { %804 = vmin.xlane.f32.xlu0 %v803_v15  ;;  %v832_v34 = vrot.slane %v831_v39, 2 }
0x11aa   :  { %v833_v35 = vmax.f32 %v831_v39, %v832_v34 }
0x11ac   :  { %v834_v12 = vrot.slane %v833_v35, 1 }
0x11ae   :  { %v835_v42 = vmax.f32 %v833_v35, %v834_v12 }
0x1235   :  { %v805_v30 = vpop.xlane.xlu0 %804 }
0x1236   :  { %vm806_vm8 = vcmp.eq.f32.partialorder %v803_v15, %v805_v30  ;;  %v811_v26 = vcvt.f32.s32 %v805_v30 }
0x1237   :  { %v807_v31 = vsel %vm806_vm8, %v802_v7, inf }
0x1238   :  { %808 = vmin.xlane.f32.xlu1 %v807_v31  ;;  %v812_v18 = vshll.u32 %v811_v26, 16 }
0x12c5   :  { %v809_v29 = vpop.xlane.xlu1 %808 }
0x12c6   :  { %v810_v40 = vcvt.f32.s32 %v809_v29 }
0x12c8   :  { %v813_v41 = vadd.s32 %v812_v18, %v810_v40 }
0x12ca   :  { %v814_v37 = vrot.slane %v813_v41, 4 }
0x12cc   :  { %vm815_vm6 = vcmp.lt.s32.totalorder %v813_v41, %v814_v37 }
0x12cd   :  { %v816_v24 = vsel %vm815_vm6, %v813_v41, %v814_v37 }
0x12ce   :  { %v817_v38 = vrot.slane %v816_v24, 2 }
0x12d0   :  { %vm818_vm7 = vcmp.lt.s32.totalorder %v816_v24, %v817_v38 }
0x12d1   :  { %v819_v46 = vsel %vm818_vm7, %v816_v24, %v817_v38 }
0x12d2   :  { %v820_v47 = vrot.slane %v819_v46, 1 }
0x12d4   :  { %vm821_vm11 = vcmp.lt.s32.totalorder %v819_v46, %v820_v47 }
0x12d5   :  { %v822_v50 = vsel %vm821_vm11, %v819_v46, %v820_v47 }
0x12d6   :  { %1233 = vpush %v822_v50 }
0x12d7   :  { %1235 = vpush %v835_v42 }
0x1307   :  { %s1234_s22 = spop %1233 }
0x1308   :  { %s1236_s23 = spop %1235  ;;  %v826_v33 = vstv %s1234_s22 }
0x1309   :  { %v837_v44 = vstv %s1236_s23  ;;  %s871_s24 = smul.f32 2.0, %s1236_s23  ;;  %v1763_v4 = vsel %vm1720_vm1, %v826_v33, %v1712_v60  ;;  %v1768_v36 = vsel %vm1725_vm13, %v826_v33, %v1717_v61 }
0x130a   :  { %vm838_vm9 = vcmp.eq.f32.partialorder %v1743_v32, %v837_v44  ;;  %vm839_vm10 = vcmp.eq.f32.partialorder %v1748_v25, %v837_v44 }
0x130b   :  { %v840_v43 = vsel %vm838_vm9, %v1443_v48, 16  ;;  %v841_v45 = vsel %vm839_vm10, %v1446_v49, 16  ;;  %s1060_s0 = sadd.f32 -2.0, %s871_s24 }
0x130c   :  { %vm842_vm0 = vcmp.lt.s32.totalorder %v840_v43, %v841_v45 }
0x130d   :  { %v843_v57 = vsel %vm842_vm0, %v840_v43, %v841_v45  ;;  %v873_v2 = vstv %s1060_s0 }
0x130e   :  { %v844_v58 = vrot.slane %v843_v57, 4  ;;  %v874_v61 = vmul.f32 1.442695, %v873_v2 }
0x1310   :  { %vm845_vm12 = vcmp.lt.s32.totalorder %v843_v57, %v844_v58  ;;  %1270 = vpow2.f32 %v874_v61 }
0x1311   :  { %v846_v59 = vsel %vm845_vm12, %v843_v57, %v844_v58 }
0x1312   :  { %v847_v51 = vrot.slane %v846_v59, 2 }
0x1314   :  { %vm848_vm15 = vcmp.lt.s32.totalorder %v846_v59, %v847_v51 }
0x1315   :  { %v849_v53 = vsel %vm848_vm15, %v846_v59, %v847_v51 }
0x1316   :  { %v850_v52 = vrot.slane %v849_v53, 1 }
0x1318   :  { %vm851_vm14 = vcmp.lt.s32.totalorder %v849_v53, %v850_v52 }
0x1319   :  { %v852_v56 = vsel %vm851_vm14, %v849_v53, %v850_v52 }
0x131a   :  { %1237 = vpush %v852_v56  ;;  %v1271_v19 = vpop.eup %1270 }
0x134b   :  { %s1756_s1 = spop %1237 }
0x134c   :  { %v854_v3 = vstv %s1756_s1  ;;  %880 = sst [smem:[#allocation3 + $0x6]] %s1756_s1  ;;  %s883_s27 = scalar_lea.vmem [#allocation2], %s1756_s1 }
0x134d   :  { %vm1771_vm5 = vcmp.eq.s32.totalorder %v1443_v48, %v854_v3  ;;  %vm1776_vm2 = vcmp.eq.s32.totalorder %v1446_v49, %v854_v3  ;;  %v884_v20 = vld [vmem:[%s883_s27] sm:$0x1] }
0x134e   :  { %v857_v60 = vsel %vm1771_vm5, %v1763_v4, 128  ;;  %v858_v62 = vsel %vm1776_vm2, %v1768_v36, 128 }
0x134f   :  { %vm859_vm1 = vcmp.lt.s32.totalorder %v857_v60, %v858_v62 }
0x1350   :  { %v860_v1 = vsel %vm859_vm1, %v857_v60, %v858_v62 }
0x1351   :  { %v861_v54 = vrot.slane %v860_v1, 4 }
0x1353   :  { %vm862_vm13 = vcmp.lt.s32.totalorder %v860_v1, %v861_v54 }
0x1354   :  { %v863_v9 = vsel %vm862_vm13, %v860_v1, %v861_v54 }
0x1355   :  { %v864_v10 = vrot.slane %v863_v9, 2 }
0x1357   :  { %vm865_vm4 = vcmp.lt.s32.totalorder %v863_v9, %v864_v10 }
0x1358   :  { %v866_v11 = vsel %vm865_vm4, %v863_v9, %v864_v10 }
0x1359   :  { %v867_v55 = vrot.slane %v866_v11, 1 }
0x135b   :  { %vm868_vm8 = vcmp.lt.s32.totalorder %v866_v11, %v867_v55 }
0x135c   :  { %v869_v13 = vsel %vm868_vm8, %v866_v11, %v867_v55 }
0x135d   :  { %1239 = vpush %v869_v13 }
0x135e   :  { %1241 = vpush %v1271_v19 }
0x138e   :  { %s1240_s25 = spop %1239 }
0x138f   :  { %882 = sst [smem:[#allocation5 + $0x6]] %s1240_s25  ;;  %v885_v63 = vstv %s1240_s25  ;;  %s1242_s26 = spop %1241 }
0x1390   :  { %vm886_vm6 = vcmp.eq.s32.totalorder %v1430_v28, %v885_v63  ;;  %878 = sst [smem:[#allocation7 + $0x6]] %s1242_s26 }
0x1391   :  { %v887_v21 = vsel %vm886_vm6, -inf, %v884_v20 }
0x1392   :  { %v889_v22 = vsel %vm270_vm3, %v887_v21, -inf  ;;  %888 = vst [vmem:[%s883_s27] sm:$0x1] %v887_v21 }
0x1393   :  { %890 = vmax.xlane.f32.xlu0 %v889_v22 }
0x1420   :  { %v891_v0 = vpop.xlane.xlu0 %890 }
0x1421   :  { %v892_v23 = vrot.slane %v891_v0, 4 }
0x1423   :  { %v893_v16 = vmax.f32 %v891_v0, %v892_v23 }
0x1425   :  { %v894_v6 = vrot.slane %v893_v16, 2 }
0x1427   :  { %v895_v15 = vmax.f32 %v893_v16, %v894_v6 }
0x1429   :  { %v896_v17 = vrot.slane %v895_v15, 1 }
0x142b   :  { %v897_v30 = vmax.f32 %v895_v15, %v896_v17 }
0x142d   :  { %1243 = vpush %v897_v30 }
0x145e   :  { %s1244_s28 = spop %1243 }
0x145f   :  { %v899_v7 = vstv %s1244_s28 }
0x1460   :  { %vm900_vm7 = vcmp.eq.f32.partialorder %v887_v21, %v899_v7  ;;  %v927_v41 = vsel %vm1771_vm5, %v899_v7, %v1743_v32  ;;  %v928_v34 = vsel %vm1776_vm2, %v899_v7, %v1748_v25 }
0x1461   :  { %v901_v31 = vsel %vm900_vm7, %v1430_v28, 128  ;;  %v932_v37 = vmax.f32 %v927_v41, %v928_v34 }
0x1462   :  { %v902_v27 = vsel %vm270_vm3, %v901_v31, 2147483647 }
0x1463   :  { %v904_v14 = vshra.s32 %v902_v27, 16  ;;  %v903_v29 = vand.u32 65535, %v902_v27  ;;  %v933_v24 = vrot.slane %v932_v37, 4 }
0x1465   :  { %v906_v26 = vcvt.s32.f32 %v904_v14  ;;  %v905_v18 = vcvt.s32.f32 %v903_v29  ;;  %v934_v46 = vmax.f32 %v932_v37, %v933_v24 }
0x1467   :  { %907 = vmin.xlane.f32.xlu1 %v906_v26  ;;  %v935_v42 = vrot.slane %v934_v46, 2 }
0x1469   :  { %v936_v45 = vmax.f32 %v934_v46, %v935_v42 }
0x146b   :  { %v937_v58 = vrot.slane %v936_v45, 1 }
0x146d   :  { %v938_v51 = vmax.f32 %v936_v45, %v937_v58 }
0x14f4   :  { %v908_v39 = vpop.xlane.xlu1 %907 }
0x14f5   :  { %vm909_vm11 = vcmp.eq.f32.partialorder %v906_v26, %v908_v39  ;;  %v914_v35 = vcvt.f32.s32 %v908_v39 }
0x14f6   :  { %v910_v40 = vsel %vm909_vm11, %v905_v18, inf }
0x14f7   :  { %911 = vmin.xlane.f32.xlu0 %v910_v40  ;;  %v915_v12 = vshll.u32 %v914_v35, 16 }
0x1584   :  { %v912_v38 = vpop.xlane.xlu0 %911 }
0x1585   :  { %v913_v47 = vcvt.f32.s32 %v912_v38 }
0x1587   :  { %v916_v50 = vadd.s32 %v915_v12, %v913_v47 }
0x1589   :  { %v917_v44 = vrot.slane %v916_v50, 4 }
0x158b   :  { %vm918_vm3 = vcmp.lt.s32.totalorder %v916_v50, %v917_v44 }
0x158c   :  { %v919_v43 = vsel %vm918_vm3, %v916_v50, %v917_v44 }
0x158d   :  { %v920_v57 = vrot.slane %v919_v43, 2 }
0x158f   :  { %vm921_vm9 = vcmp.lt.s32.totalorder %v919_v43, %v920_v57 }
0x1590   :  { %v922_v32 = vsel %vm921_vm9, %v919_v43, %v920_v57 }
0x1591   :  { %v923_v59 = vrot.slane %v922_v32, 1 }
0x1593   :  { %vm924_vm10 = vcmp.lt.s32.totalorder %v922_v32, %v923_v59 }
0x1594   :  { %v925_v25 = vsel %vm924_vm10, %v922_v32, %v923_v59 }
0x1595   :  { %1245 = vpush %v925_v25 }
0x1596   :  { %1247 = vpush %v938_v51 }
0x15c6   :  { %s1246_s29 = spop %1245 }
0x15c7   :  { %s1248_s30 = spop %1247  ;;  %v929_v54 = vstv %s1246_s29 }
0x15c8   :  { %v940_v53 = vstv %s1248_s30  ;;  %s974_s5 = smul.f32 2.0, %s1248_s30  ;;  %v930_v11 = vsel %vm1771_vm5, %v929_v54, %v1763_v4  ;;  %v931_v55 = vsel %vm1776_vm2, %v929_v54, %v1768_v36 }
0x15c9   :  { %vm941_vm0 = vcmp.eq.f32.partialorder %v927_v41, %v940_v53  ;;  %vm942_vm12 = vcmp.eq.f32.partialorder %v928_v34, %v940_v53 }
0x15ca   :  { %v943_v52 = vsel %vm941_vm0, %v1443_v48, 16  ;;  %v944_v56 = vsel %vm942_vm12, %v1446_v49, 16  ;;  %s1061_s6 = sadd.f32 -2.0, %s974_s5 }
0x15cb   :  { %vm945_vm15 = vcmp.lt.s32.totalorder %v943_v52, %v944_v56 }
0x15cc   :  { %v946_v33 = vsel %vm945_vm15, %v943_v52, %v944_v56  ;;  %v976_v9 = vstv %s1061_s6 }
0x15cd   :  { %v947_v2 = vrot.slane %v946_v33, 4 }
0x15cf   :  { %vm948_vm14 = vcmp.lt.s32.totalorder %v946_v33, %v947_v2 }
0x15d0   :  { %v949_v3 = vsel %vm948_vm14, %v946_v33, %v947_v2 }
0x15d1   :  { %v950_v60 = vrot.slane %v949_v3, 2 }
0x15d3   :  { %vm951_vm1 = vcmp.lt.s32.totalorder %v949_v3, %v950_v60 }
0x15d4   :  { %v952_v62 = vsel %vm951_vm1, %v949_v3, %v950_v60 }
0x15d5   :  { %v953_v61 = vrot.slane %v952_v62, 1 }
0x15d7   :  { %vm954_vm13 = vcmp.lt.s32.totalorder %v952_v62, %v953_v61 }
0x15d8   :  { %v955_v1 = vsel %vm954_vm13, %v952_v62, %v953_v61 }
0x15d9   :  { %1249 = vpush %v955_v1 }
0x160a   :  { %s1799_s7 = spop %1249 }
0x160b   :  { %v957_v10 = vstv %s1799_s7  ;;  %983 = sst [smem:[#allocation3 + $0x7]] %s1799_s7 }
0x160c   :  { %vm958_vm4 = vcmp.eq.s32.totalorder %v1443_v48, %v957_v10  ;;  %vm959_vm8 = vcmp.eq.s32.totalorder %v1446_v49, %v957_v10 }
0x160d   :  { %1283 = shalt.err (!%p1280_p2)
}
0x160e   :  { %s1308_s15 = smov [#allocation3]   ;;  %v960_v48 = vsel %vm958_vm4, %v930_v11, 128  ;;  %v961_v49 = vsel %vm959_vm8, %v931_v55, 128  ;;  %v977_v4 = vmul.f32 1.442695, %v976_v9  ;;  %s986_s19 = scalar_lea.vmem [#allocation2], %s1799_s7 }
0x160f   :  { %999 = dma.smem_to_hbm %s1308_s15, 16, %s1851_s2, [#allocation4]   ;;  %vm962_vm5 = vcmp.lt.s32.totalorder %v960_v48, %v961_v49  ;;  %v987_v0 = vld [vmem:[%s986_s19] sm:$0x1] }
0x1610   :  { %v963_v36 = vsel %vm962_vm5, %v960_v48, %v961_v49  ;;  %1272 = vpow2.f32 %v977_v4  ;;  %s1284_s22 = scalar_lea.hbm %s1852_s3, 16 }
0x1611   :  { %v964_v5 = vrot.slane %v963_v36, 4  ;;  %p1285_p3 = scmp.ne.s32.totalorder %s1852_s3, %s1284_s22  ;;  %p1288_p4 = scmp.lt.u32.totalorder %s1284_s22, %s1852_s3 }
0x1613   :  { %vm965_vm2 = vcmp.lt.s32.totalorder %v963_v36, %v964_v5  ;;  %p1290_p5 = pnand %p1288_p4, %p1285_p3 }
0x1614   :  { %v966_v8 = vsel %vm965_vm2, %v963_v36, %v964_v5 }
0x1615   :  { %v967_v13 = vrot.slane %v966_v8, 2 }
0x1617   :  { %vm968_vm6 = vcmp.lt.s32.totalorder %v966_v8, %v967_v13 }
0x1618   :  { %v969_v19 = vsel %vm968_vm6, %v966_v8, %v967_v13 }
0x1619   :  { %v970_v63 = vrot.slane %v969_v19, 1 }
0x161a   :  { %v1273_v21 = vpop.eup %1272 }
0x161b   :  { %vm971_vm7 = vcmp.lt.s32.totalorder %v969_v19, %v970_v63 }
0x161c   :  { %v972_v20 = vsel %vm971_vm7, %v969_v19, %v970_v63 }
0x161d   :  { %1251 = vpush %v972_v20 }
0x161e   :  { %1253 = vpush %v1273_v21 }
0x164e   :  { %s1252_s2 = spop %1251 }
0x164f   :  { %985 = sst [smem:[#allocation5 + $0x7]] %s1252_s2  ;;  %v988_v22 = vstv %s1252_s2  ;;  %s1254_s18 = spop %1253 }
0x1650   :  { %vm989_vm11 = vcmp.eq.s32.totalorder %v1430_v28, %v988_v22  ;;  %981 = sst [smem:[#allocation7 + $0x7]] %s1254_s18 }
0x1651   :  { %v990_v23 = vsel %vm989_vm11, -inf, %v987_v0 }
0x1652   :  { %1293 = shalt.err (!%p1290_p5)
}
0x1653   :  { %s1309_s25 = smov [#allocation5]   ;;  %991 = vst [vmem:[%s986_s19] sm:$0x1] %v990_v23  ;;  %s1294_s30 = scalar_lea.hbm %s1853_s4, 16 }
0x1654   :  { %1007 = dma.smem_to_hbm %s1309_s25, 16, %s1852_s3, [#allocation6]  }
0x1655   :  { %p1295_p6 = scmp.ne.s32.totalorder %s1853_s4, %s1294_s30  ;;  %p1298_p7 = scmp.lt.u32.totalorder %s1294_s30, %s1853_s4 }
0x1657   :  { %p1300_p8 = pnand %p1298_p7, %p1295_p6 }
0x1659   :  { %1303 = shalt.err (!%p1300_p8)
}
0x165a   :  { %s1310_s9 = smov [#allocation7]  }
0x165b   :  { %1015 = dma.smem_to_hbm %s1310_s9, 16, %s1853_s4, [#allocation6]  }
0x165c   :  { %1304 = dma.done.wait [#allocation4], 16  }
0x165d   :  { %1305 = vsyncadd [#allocation4], 4294967280 }
0x165e   :  { %1306 = dma.done.wait [#allocation6], 32  }
0x165f   :  { %1307 = vsyncadd [#allocation6], 4294967264 }
0x1660   :  { %1025 = sfence }
0x1661   :  { %1026 = vsyncpa [#allocation4], 1 }
0x1662   :  { %1027 = vsyncpa [#allocation6], 1 }

</bundles_post_ra>
